<compile_context>
chip_gen: v7x
topology: tpu7x:2x2x1
jax: 0.10.0
libtpu: 0.0.40
codegen_flags: <defaults>
</compile_context>

<pallas_src>
import math

import jax
import jax.numpy as jnp
import numpy as np
from jax import lax
from jax.experimental import pallas as pl
from jax.experimental.pallas import tpu as pltpu


_LANES = 128
_COMPILER_PARAMS = pltpu.CompilerParams(
    dimension_semantics=("parallel",),
    vmem_limit_bytes=32 * 1024 * 1024,   # explicit; raise further for WRN widths
)


def _rup(c, m=_LANES):
    return ((c + m - 1) // m) * m


# ----------------------------- in-kernel helpers ----------------------------

def _pad_hw1(x):
    """Zero-pad a (H, W, C) value by 1 on each spatial side, in registers."""
    H, W, C = x.shape
    col = jnp.zeros((H, 1, C), x.dtype)
    body = jnp.concatenate([col, x, col], axis=1)            # (H, W+2, C)
    row = jnp.zeros((1, W + 2, C), x.dtype)
    return jnp.concatenate([row, body, row], axis=0)         # (H+2, W+2, C)


def _conv2_ge_tail(acc1, res, s2_ref, h2_ref, w2_ref,
                   mw1_ref, mb1_ref, mw2_ref, mb2_ref,
                   out_ref, zpad_ref, H, W, Cp):
    """BN2+ReLU -> 3x3 conv (stride 1) -> Gather-Excite gate -> + residual."""
    M = H * W
    # bn2 + relu fused on conv1's f32 accumulator (VPU math stays f32).
    z = jnp.maximum(acc1 * s2_ref[...] + h2_ref[...], 0.0)           # (M, Cp) f32
    # TODO(synk): dropRate=0.0 in this config -> dropout omitted.
    # Single full-width store of the zero-padded bf16 canvas for conv2's taps.
    zpad_ref[...] = _pad_hw1(z.reshape(H, W, Cp)).astype(jnp.bfloat16)
    # 3x3 conv as 3 K-fused bf16 matmuls (K = 3*Cp), f32 accumulation.
    acc2 = None
    for di in range(3):
        tap = jnp.concatenate(
            [zpad_ref[di:di + H, dj:dj + W, :] for dj in range(3)], axis=-1)
        part = jnp.dot(tap.reshape(M, 3 * Cp), w2_ref[di],
                       preferred_element_type=jnp.float32)
        acc2 = part if acc2 is None else acc2 + part
    # Gather-Excite: global-average gather (extent=0) + 1x1 MLP excite + sigmoid.
    # TODO(synk): tiny 1-row matmuls; could move to VPU to dodge the MXU drain.
    gm = jnp.mean(acc2, axis=0, keepdims=True)                       # (1, Cp) f32
    gh = jnp.maximum(jnp.dot(gm, mw1_ref[...],
                             preferred_element_type=jnp.float32) + mb1_ref[...], 0.0)
    gg = jnp.dot(gh, mw2_ref[...], preferred_element_type=jnp.float32) + mb2_ref[...]
    out = res + acc2 * jax.nn.sigmoid(gg)                            # (M, Cp) f32
    # Emit the zero-border-padded bf16 slab (ready for the next block's prologue).
    out_ref[...] = _pad_hw1(out.reshape(H, W, Cp)).astype(out_ref.dtype)


def _make_block_kernel_s1(H, W, Cpi, Cpo, equal):
    """Fused BasicBlock kernel, stride=1.  I/O are padded bf16 NHWC slabs."""
    Hp, Wp = H + 2, W + 2
    M = H * W

    def body(x_ref, s1_ref, h1_ref, w1_ref, ws_ref,
             s2_ref, h2_ref, w2_ref, mw1_ref, mb1_ref, mw2_ref, mb2_ref,
             out_ref, o_scr, zpad_scr):
        # BN1 + ReLU prologue; iota border mask reproduces the conv zero pad.
        xp = x_ref[...].astype(jnp.float32)                          # (Hp, Wp, Cpi)
        o = jnp.maximum(xp * s1_ref[...] + h1_ref[...], 0.0)
        r = lax.broadcasted_iota(jnp.int32, (Hp, Wp, Cpi), 0)
        q = lax.broadcasted_iota(jnp.int32, (Hp, Wp, Cpi), 1)
        interior = (r > 0) & (r < Hp - 1) & (q > 0) & (q < Wp - 1)
        o_scr[...] = jnp.where(interior, o, 0.0).astype(jnp.bfloat16)
        # 3x3 conv (stride 1): 3 K-fused bf16 matmuls on slices of the canvas ref.
        acc1 = None
        for di in range(3):
            tap = jnp.concatenate(
                [o_scr[di:di + H, dj:dj + W, :] for dj in range(3)], axis=-1)
            part = jnp.dot(tap.reshape(M, 3 * Cpi), w1_ref[di],
                           preferred_element_type=jnp.float32)
            acc1 = part if acc1 is None else acc1 + part
        if equal:
            res = x_ref[1:H + 1, 1:W + 1, :].astype(jnp.float32).reshape(M, Cpi)
        else:
            oi = o_scr[1:H + 1, 1:W + 1, :].reshape(M, Cpi)          # bf16
            res = jnp.dot(oi, ws_ref[...], preferred_element_type=jnp.float32)
        _conv2_ge_tail(acc1, res, s2_ref, h2_ref, w2_ref,
                       mw1_ref, mb1_ref, mw2_ref, mb2_ref,
                       out_ref, zpad_scr, H, W, Cpo)

    if equal:
        def kernel(x_ref, s1_ref, h1_ref, w1_ref,
                   s2_ref, h2_ref, w2_ref, mw1_ref, mb1_ref, mw2_ref, mb2_ref,
                   out_ref, o_scr, zpad_scr):
            body(x_ref, s1_ref, h1_ref, w1_ref, None,
                 s2_ref, h2_ref, w2_ref, mw1_ref, mb1_ref, mw2_ref, mb2_ref,
                 out_ref, o_scr, zpad_scr)
        return kernel
    return body


def _make_block_kernel_s2(H2, W2, C4p, Cpo):
    """Fused BasicBlock kernel, stride=2 via 2x2 space-to-depth repack."""
    Hq, Wq = H2 + 1, W2 + 1
    M = H2 * W2

    def kernel(r_ref, ar_ref, ac_ref, s1_ref, h1_ref, w1_ref, ws_ref,
               s2_ref, h2_ref, w2_ref, mw1_ref, mb1_ref, mw2_ref, mb2_ref,
               out_ref, o_scr, zpad_scr):
        xp = r_ref[...].astype(jnp.float32)                          # (Hq, Wq, C4p)
        o = jnp.maximum(xp * s1_ref[...] + h1_ref[...], 0.0)
        # Border mask for the repack: iota vs tiny per-channel sub-position codes
        # (1: a==0, 2: a==1, 0: lane padding -> never masked; already zero).
        r = lax.broadcasted_iota(jnp.int32, (Hq, Wq, C4p), 0)
        q = lax.broadcasted_iota(jnp.int32, (Hq, Wq, C4p), 1)
        ar = ar_ref[...]
        ac = ac_ref[...]
        border = (((r == 0) & (ar == 1)) | ((r == Hq - 1) & (ar == 2)) |
                  ((q == 0) & (ac == 1)) | ((q == Wq - 1) & (ac == 2)))
        o_scr[...] = jnp.where(border, 0.0, o).astype(jnp.bfloat16)
        # Stride-2 3x3 conv == stride-1 2x2 conv on the repack: 2 K-fused matmuls.
        acc1 = None
        for dp in range(2):
            tap = jnp.concatenate(
                [o_scr[dp:dp + H2, dq:dq + W2, :] for dq in range(2)], axis=-1)
            part = jnp.dot(tap.reshape(M, 2 * C4p), w1_ref[dp],
                           preferred_element_type=jnp.float32)
            acc1 = part if acc1 is None else acc1 + part
        # Strided 1x1 shortcut folds into the repack (nonzero only on the
        # (a_r=1, a_c=1) channel group of ws).
        res = jnp.dot(o_scr[0:H2, 0:W2, :].reshape(M, C4p), ws_ref[...],
                      preferred_element_type=jnp.float32)
        _conv2_ge_tail(acc1, res, s2_ref, h2_ref, w2_ref,
                       mw1_ref, mb1_ref, mw2_ref, mb2_ref,
                       out_ref, zpad_scr, H2, W2, Cpo)
    return kernel


# ------------------------- host-side glue / params --------------------------

def _rep_spec(shape):
    zeros = (0,) * len(shape)
    return pl.BlockSpec(tuple(shape), lambda n: zeros)


def _bat_spec(shape):
    zeros = (0,) * len(shape)
    return pl.BlockSpec((None,) + tuple(shape), lambda n: (n,) + zeros)


def _pad_axis(a, axis, new):
    pad = [(0, 0)] * a.ndim
    pad[axis] = (0, new - a.shape[axis])
    return jnp.pad(a, pad)


def _space_to_depth2(xp):
    N, Hp, Wp, C = xp.shape
    r = xp.reshape(N, Hp // 2, 2, Wp // 2, 2, C)
    r = r.transpose(0, 1, 3, 2, 4, 5)
    return r.reshape(N, Hp // 2, Wp // 2, 4 * C)


def _s2_conv_weights(w):
    # (3, 3, Cin, Co) HWIO -> (4, 4*Cin, Co) macro-taps (stride-2 as 2x2 on repack).
    Cin, Co = w.shape[2], w.shape[3]
    zero = jnp.zeros((Cin, Co), w.dtype)
    blocks = []
    for dp in (0, 1):
        for dq in (0, 1):
            parts = []
            for a_r in (0, 1):
                for a_c in (0, 1):
                    di, dj = 2 * dp + a_r, 2 * dq + a_c
                    parts.append(w[di, dj] if (di < 3 and dj < 3) else zero)
            blocks.append(jnp.concatenate(parts, axis=0))
    return jnp.stack(blocks, axis=0)


def _fuse3_conv_w(w, Kp, Np):
    """(3,3,Ci,Co) -> (3, 3*Kp, Np) bf16 K-fused (over dj) tap weights."""
    w = _pad_axis(_pad_axis(w, 2, Kp), 3, Np)
    return jnp.stack(
        [jnp.concatenate([w[di, 0], w[di, 1], w[di, 2]], axis=0) for di in range(3)],
        axis=0).astype(jnp.bfloat16)


def _tail_params(p, Cpo, Crp):
    w2f = _fuse3_conv_w(p["conv2_w"], Cpo, Cpo)               # (3, 3*Cpo, Cpo) bf16
    s2 = _pad_axis(p["bn2_scale"], 1, Cpo)
    h2 = _pad_axis(p["bn2_shift"], 1, Cpo)
    mw1 = _pad_axis(_pad_axis(p["mlp_w1"], 0, Cpo), 1, Crp)
    mb1 = _pad_axis(p["mlp_b1"], 1, Crp)
    mw2 = _pad_axis(_pad_axis(p["mlp_w2"], 0, Crp), 1, Cpo)
    mb2 = _pad_axis(p["mlp_b2"], 1, Cpo)
    return w2f, s2, h2, mw1, mb1, mw2, mb2


def basic_block_call_s1(xp, p, equal):
    """xp: (N, H+2, W+2, Cpi) bf16 zero-border-padded, lane-padded slab."""
    N, Hp, Wp, Cpi = xp.shape
    H, W = Hp - 2, Wp - 2
    Cin, Co = p["conv1_w"].shape[2], p["conv1_w"].shape[3]
    Cr = p["mlp_w1"].shape[-1]
    Cpo, Crp = _rup(Co), _rup(Cr)
    assert Cpi >= Cin
    if equal:
        assert Cpi == Cpo

    w1f = _fuse3_conv_w(p["conv1_w"], Cpi, Cpo)               # (3, 3*Cpi, Cpo) bf16
    s1 = _pad_axis(p["bn1_scale"], 1, Cpi).reshape(1, 1, Cpi)
    h1 = _pad_axis(p["bn1_shift"], 1, Cpi).reshape(1, 1, Cpi)
    w2f, s2, h2, mw1, mb1, mw2, mb2 = _tail_params(p, Cpo, Crp)

    args = [xp, s1, h1, w1f]
    in_specs = [_bat_spec((Hp, Wp, Cpi)),
                _rep_spec((1, 1, Cpi)), _rep_spec((1, 1, Cpi)),
                _rep_spec((3, 3 * Cpi, Cpo))]
    if not equal:
        ws = _pad_axis(_pad_axis(p["short_w"], 0, Cpi), 1, Cpo).astype(jnp.bfloat16)
        args.append(ws)
        in_specs.append(_rep_spec((Cpi, Cpo)))
    args += [s2, h2, w2f, mw1, mb1, mw2, mb2]
    in_specs += [_rep_spec((1, Cpo)), _rep_spec((1, Cpo)),
                 _rep_spec((3, 3 * Cpo, Cpo)),
                 _rep_spec((Cpo, Crp)), _rep_spec((1, Crp)),
                 _rep_spec((Crp, Cpo)), _rep_spec((1, Cpo))]

    kernel = _make_block_kernel_s1(H, W, Cpi, Cpo, equal)
    return pl.pallas_call(
        kernel,
        out_shape=jax.ShapeDtypeStruct((N, Hp, Wp, Cpo), jnp.bfloat16),
        grid=(N,),
        in_specs=in_specs,
        out_specs=_bat_spec((Hp, Wp, Cpo)),
        scratch_shapes=[pltpu.VMEM((Hp, Wp, Cpi), jnp.bfloat16),
                        pltpu.VMEM((Hp, Wp, Cpo), jnp.bfloat16)],
        compiler_params=_COMPILER_PARAMS,
    )(*args)


def basic_block_call_s2(x, p):
    """x: (N, H, W, Cin) unpadded NHWC f32 block input (first layer only)."""
    N, H, W, Cin = x.shape
    assert H % 2 == 0 and W % 2 == 0
    H2, W2 = H // 2, W // 2
    Co = p["conv1_w"].shape[3]
    Cr = p["mlp_w1"].shape[-1]
    C4 = 4 * Cin
    C4p, Cpo, Crp = _rup(C4), _rup(Co), _rup(Cr)

    # 2x2 space-to-depth of the spatially zero-padded input, lane-padded, bf16.
    xpad = jnp.pad(x, ((0, 0), (1, 1), (1, 1), (0, 0)))
    R = _pad_axis(_space_to_depth2(xpad), 3, C4p).astype(jnp.bfloat16)

    # per-channel 2x2 sub-position codes for the in-kernel border mask.
    ar = np.zeros((1, 1, C4p), np.int32)
    ac = np.zeros((1, 1, C4p), np.int32)
    for c in range(C4):
        ar[0, 0, c] = 1 + (c // (2 * Cin))
        ac[0, 0, c] = 1 + ((c // Cin) % 2)
    ar = jnp.asarray(ar)
    ac = jnp.asarray(ac)

    blk = _s2_conv_weights(p["conv1_w"])                      # (4, 4Cin, Co)
    blk = _pad_axis(_pad_axis(blk, 1, C4p), 2, Cpo)           # (4, C4p, Cpo)
    w1f = jnp.stack([jnp.concatenate([blk[2 * dp], blk[2 * dp + 1]], axis=0)
                     for dp in range(2)], axis=0).astype(jnp.bfloat16)

    ws4 = jnp.concatenate(
        [jnp.zeros((3 * Cin, Co), jnp.float32), p["short_w"]], axis=0)
    ws4 = _pad_axis(_pad_axis(ws4, 0, C4p), 1, Cpo).astype(jnp.bfloat16)

    s1 = _pad_axis(jnp.tile(p["bn1_scale"], (1, 4)), 1, C4p).reshape(1, 1, C4p)
    h1 = _pad_axis(jnp.tile(p["bn1_shift"], (1, 4)), 1, C4p).reshape(1, 1, C4p)
    w2f, s2, h2, mw1, mb1, mw2, mb2 = _tail_params(p, Cpo, Crp)

    kernel = _make_block_kernel_s2(H2, W2, C4p, Cpo)
    args = [R, ar, ac, s1, h1, w1f, ws4, s2, h2, w2f, mw1, mb1, mw2, mb2]
    in_specs = [_bat_spec((H2 + 1, W2 + 1, C4p)),
                _rep_spec((1, 1, C4p)), _rep_spec((1, 1, C4p)),
                _rep_spec((1, 1, C4p)), _rep_spec((1, 1, C4p)),
                _rep_spec((2, 2 * C4p, Cpo)), _rep_spec((C4p, Cpo)),
                _rep_spec((1, Cpo)), _rep_spec((1, Cpo)),
                _rep_spec((3, 3 * Cpo, Cpo)),
                _rep_spec((Cpo, Crp)), _rep_spec((1, Crp)),
                _rep_spec((Crp, Cpo)), _rep_spec((1, Cpo))]
    return pl.pallas_call(
        kernel,
        out_shape=jax.ShapeDtypeStruct((N, H2 + 2, W2 + 2, Cpo), jnp.bfloat16),
        grid=(N,),
        in_specs=in_specs,
        out_specs=_bat_spec((H2 + 2, W2 + 2, Cpo)),
        scratch_shapes=[pltpu.VMEM((H2 + 1, W2 + 1, C4p), jnp.bfloat16),
                        pltpu.VMEM((H2 + 2, W2 + 2, Cpo), jnp.bfloat16)],
        compiler_params=_COMPILER_PARAMS,
    )(*args)


def network_block_forward(x_nchw, layer_params, stride):
    x = jnp.transpose(x_nchw, (0, 2, 3, 1))                   # NCHW -> NHWC, f32
    p0 = layer_params[0]
    if stride == 2:
        # identity shortcut with stride>1 is inconsistent; never used by the module.
        assert not p0["equal_in_out"]
        xp = basic_block_call_s2(x, p0)
    elif stride == 1:
        Cin = x.shape[-1]
        xp = jnp.pad(_pad_axis(x, 3, _rup(Cin)),
                     ((0, 0), (1, 1), (1, 1), (0, 0))).astype(jnp.bfloat16)
        xp = basic_block_call_s1(xp, p0, p0["equal_in_out"])
    else:
        raise NotImplementedError("only stride 1 or 2 supported")
    for p in layer_params[1:]:
        xp = basic_block_call_s1(xp, p, p["equal_in_out"])
    Co = layer_params[-1]["conv1_w"].shape[-1]
    y = xp[:, 1:-1, 1:-1, :Co].astype(jnp.float32)            # strip border + lanes
    return jnp.transpose(y, (0, 3, 1, 2))                     # NHWC -> NCHW


# ------------------------------ init & reference ----------------------------

def init_basic_block(key, in_planes, out_planes, reduction=2):
    ks = list(jax.random.split(key, 16))
    eps = 1e-5

    def nrm(k, shape, std):
        return (std * jax.random.normal(k, shape)).astype(jnp.float32)

    def bn(kg, kb, km, kv, c):
        gamma = 1.0 + 0.1 * jax.random.normal(kg, (c,))
        beta = 0.1 * jax.random.normal(kb, (c,))
        mean = 0.1 * jax.random.normal(km, (c,))
        var = 1.0 + 0.1 * jax.random.uniform(kv, (c,))
        scale = gamma / jnp.sqrt(var + eps)
        shift = beta - mean * scale
        return (scale.reshape(1, c).astype(jnp.float32),
                shift.reshape(1, c).astype(jnp.float32))

    p = {}
    p["bn1_scale"], p["bn1_shift"] = bn(ks[0], ks[1], ks[2], ks[3], in_planes)
    p["bn2_scale"], p["bn2_shift"] = bn(ks[4], ks[5], ks[6], ks[7], out_planes)
    p["conv1_w"] = nrm(ks[8], (3, 3, in_planes, out_planes),
                       math.sqrt(2.0 / (9 * in_planes)))
    p["conv2_w"] = nrm(ks[9], (3, 3, out_planes, out_planes),
                       math.sqrt(2.0 / (9 * out_planes)))
    cr = max(out_planes // reduction, 1)
    p["mlp_w1"] = nrm(ks[10], (out_planes, cr), math.sqrt(2.0 / out_planes))
    p["mlp_b1"] = jnp.zeros((1, cr), jnp.float32)
    p["mlp_w2"] = nrm(ks[11], (cr, out_planes), math.sqrt(2.0 / cr))
    p["mlp_b2"] = jnp.zeros((1, out_planes), jnp.float32)
    p["equal_in_out"] = (in_planes == out_planes)
    if not p["equal_in_out"]:
        p["short_w"] = nrm(ks[12], (in_planes, out_planes), math.sqrt(2.0 / in_planes))
    return p


def _conv_ref(x, w, s):
    return lax.conv_general_dilated(x, w, (s, s), ((1, 1), (1, 1)),
                                    dimension_numbers=("NHWC", "HWIO", "NHWC"),
                                    preferred_element_type=jnp.float32)


def _block_ref(x, p, stride, cdt):
    def bnrelu(z, scale, shift):
        return jnp.maximum(z * scale.reshape(1, 1, 1, -1)
                           + shift.reshape(1, 1, 1, -1), 0.0)
    xf = x.astype(jnp.float32)
    o = bnrelu(xf, p["bn1_scale"], p["bn1_shift"])
    y = _conv_ref(o.astype(cdt), p["conv1_w"].astype(cdt), stride)
    y = bnrelu(y, p["bn2_scale"], p["bn2_shift"])
    y = _conv_ref(y.astype(cdt), p["conv2_w"].astype(cdt), 1)
    if p["equal_in_out"]:
        res = xf
    else:
        res = jnp.einsum("nhwc,cd->nhwd", o[:, ::stride, ::stride, :].astype(cdt),
                         p["short_w"].astype(cdt),
                         preferred_element_type=jnp.float32)
    m = jnp.mean(y, axis=(1, 2), keepdims=True)
    h = jnp.maximum(jnp.einsum("nijc,cd->nijd", m, p["mlp_w1"])
                    + p["mlp_b1"].reshape(1, 1, 1, -1), 0.0)
    g = jnp.einsum("nijd,dc->nijc", h, p["mlp_w2"]) + p["mlp_b2"].reshape(1, 1, 1, -1)
    return res + y * jax.nn.sigmoid(g)


def _network_block_ref(x_nchw, layer_params, stride,
                       cdt=jnp.float32, act_dtype=jnp.float32):
    x = jnp.transpose(x_nchw, (0, 2, 3, 1))
    for i, p in enumerate(layer_params):
        x = _block_ref(x.astype(act_dtype), p, stride if i == 0 else 1, cdt)
        x = x.astype(act_dtype)
    return jnp.transpose(x.astype(jnp.float32), (0, 3, 1, 2))


# ----------------------------------- main ------------------------------------

if __name__ == "__main__":
    key = jax.random.PRNGKey(0)
    kx, k0, k1 = jax.random.split(key, 3)

    # NetworkBlock(nb_layers=2, in_planes=4, out_planes=8, block=BasicBlock(GE),
    #              stride=2, spatial=16, extent=0, extra_params=False, mlp=True,
    #              dropRate=0.0)
    nb_layers, in_planes, out_planes, stride = 2, 4, 8, 2
    x = jax.random.normal(kx, (2, in_planes, 16, 16), jnp.float32)   # NCHW

    layer_params = [init_basic_block(k0, in_planes, out_planes),
                    init_basic_block(k1, out_planes, out_planes)]

    out = network_block_forward(x, layer_params, stride)
    out = jax.block_until_ready(out)
    assert out.shape == (2, out_planes, 8, 8)

    # Tight check vs. a reference that mirrors the kernel's bf16 operand /
    # inter-block-activation rounding (validates the fused kernel math itself).
    ref_bf16 = _network_block_ref(x, layer_params, stride,
                                  cdt=jnp.bfloat16, act_dtype=jnp.bfloat16)
    np.testing.assert_allclose(np.asarray(out), np.asarray(ref_bf16),
                               rtol=5e-3, atol=5e-3)
    # End-to-end accuracy check vs. the pure-f32 module math.
    ref_f32 = _network_block_ref(x, layer_params, stride)
    np.testing.assert_allclose(np.asarray(out), np.asarray(ref_f32),
                               rtol=5e-2, atol=5e-2)
    print("KERNEL_OK")
</pallas_src>

<mosaic_0001>
module attributes {stable_mosaic.version = 11 : i64} {
  func.func @kernel(%arg0: i32, %arg1: memref<1x9x9x128xbf16, #tpu.memory_space<vmem>>, %arg2: memref<1x1x128xi32, #tpu.memory_space<vmem>>, %arg3: memref<1x1x128xi32, #tpu.memory_space<vmem>>, %arg4: memref<1x1x128xf32, #tpu.memory_space<vmem>>, %arg5: memref<1x1x128xf32, #tpu.memory_space<vmem>>, %arg6: memref<2x256x128xbf16, #tpu.memory_space<vmem>>, %arg7: memref<128x128xbf16, #tpu.memory_space<vmem>>, %arg8: memref<1x128xf32, #tpu.memory_space<vmem>>, %arg9: memref<1x128xf32, #tpu.memory_space<vmem>>, %arg10: memref<3x384x128xbf16, #tpu.memory_space<vmem>>, %arg11: memref<128x128xf32, #tpu.memory_space<vmem>>, %arg12: memref<1x128xf32, #tpu.memory_space<vmem>>, %arg13: memref<128x128xf32, #tpu.memory_space<vmem>>, %arg14: memref<1x128xf32, #tpu.memory_space<vmem>>, %arg15: memref<1x10x10x128xbf16, #tpu.memory_space<vmem>>, %arg16: memref<9x9x128xbf16, #tpu.memory_space<vmem>>, %arg17: memref<10x10x128xbf16, #tpu.memory_space<vmem>>) attributes {dimension_semantics = [#tpu.dimension_semantics<parallel>], iteration_bounds = array<i64: 2>, scalar_prefetch = 0 : i64, scratch_operands = 2 : i64, tpu.core_type = #tpu.core_type<tc>, window_params = [{transform_indices = @transform_0, window_bounds = array<i64: 1, 9, 9, 128>}, {pipeline_mode = #tpu.pipeline_mode<synchronous>, transform_indices = @transform_1, window_bounds = array<i64: 1, 1, 128>}, {pipeline_mode = #tpu.pipeline_mode<synchronous>, transform_indices = @transform_2, window_bounds = array<i64: 1, 1, 128>}, {pipeline_mode = #tpu.pipeline_mode<synchronous>, transform_indices = @transform_3, window_bounds = array<i64: 1, 1, 128>}, {pipeline_mode = #tpu.pipeline_mode<synchronous>, transform_indices = @transform_4, window_bounds = array<i64: 1, 1, 128>}, {pipeline_mode = #tpu.pipeline_mode<synchronous>, transform_indices = @transform_5, window_bounds = array<i64: 2, 256, 128>}, {pipeline_mode = #tpu.pipeline_mode<synchronous>, transform_indices = @transform_6, window_bounds = array<i64: 128, 128>}, {pipeline_mode = #tpu.pipeline_mode<synchronous>, transform_indices = @transform_7, window_bounds = array<i64: 1, 128>}, {pipeline_mode = #tpu.pipeline_mode<synchronous>, transform_indices = @transform_8, window_bounds = array<i64: 1, 128>}, {pipeline_mode = #tpu.pipeline_mode<synchronous>, transform_indices = @transform_9, window_bounds = array<i64: 3, 384, 128>}, {pipeline_mode = #tpu.pipeline_mode<synchronous>, transform_indices = @transform_10, window_bounds = array<i64: 128, 128>}, {pipeline_mode = #tpu.pipeline_mode<synchronous>, transform_indices = @transform_11, window_bounds = array<i64: 1, 128>}, {pipeline_mode = #tpu.pipeline_mode<synchronous>, transform_indices = @transform_12, window_bounds = array<i64: 128, 128>}, {pipeline_mode = #tpu.pipeline_mode<synchronous>, transform_indices = @transform_13, window_bounds = array<i64: 1, 128>}, {transform_indices = @transform_14, window_bounds = array<i64: 1, 10, 10, 128>}]} {
    %c0 = arith.constant 0 : index
    %c0_0 = arith.constant 0 : index
    %c0_1 = arith.constant 0 : index
    %c0_2 = arith.constant 0 : index
    %0 = vector.load %arg1[%c0, %c0_0, %c0_1, %c0_2] : memref<1x9x9x128xbf16, #tpu.memory_space<vmem>>, vector<1x9x9x128xbf16>
    %1 = vector.shape_cast %0 : vector<1x9x9x128xbf16> to vector<9x9x128xbf16>
    %2 = arith.extf %1 : vector<9x9x128xbf16> to vector<9x9x128xf32>
    %c0_3 = arith.constant 0 : index
    %c0_4 = arith.constant 0 : index
    %c0_5 = arith.constant 0 : index
    %3 = vector.load %arg4[%c0_3, %c0_4, %c0_5] : memref<1x1x128xf32, #tpu.memory_space<vmem>>, vector<1x1x128xf32>
    %4 = vector.broadcast %3 : vector<1x1x128xf32> to vector<9x9x128xf32>
    %5 = arith.mulf %2, %4 : vector<9x9x128xf32>
    %c0_6 = arith.constant 0 : index
    %c0_7 = arith.constant 0 : index
    %c0_8 = arith.constant 0 : index
    %6 = vector.load %arg5[%c0_6, %c0_7, %c0_8] : memref<1x1x128xf32, #tpu.memory_space<vmem>>, vector<1x1x128xf32>
    %7 = vector.broadcast %6 : vector<1x1x128xf32> to vector<9x9x128xf32>
    %8 = arith.addf %5, %7 : vector<9x9x128xf32>
    %cst = arith.constant 0.000000e+00 : f32
    %9 = vector.broadcast %cst : f32 to vector<9x9x128xf32>
    %10 = arith.maximumf %8, %9 : vector<9x9x128xf32>
    %11 = tpu.iota {dimensions = array<i32: 0>} : vector<9x9x128xi32>
    %12 = tpu.iota {dimensions = array<i32: 1>} : vector<9x9x128xi32>
    %c0_9 = arith.constant 0 : index
    %c0_10 = arith.constant 0 : index
    %c0_11 = arith.constant 0 : index
    %13 = vector.load %arg2[%c0_9, %c0_10, %c0_11] : memref<1x1x128xi32, #tpu.memory_space<vmem>>, vector<1x1x128xi32>
    %c0_12 = arith.constant 0 : index
    %c0_13 = arith.constant 0 : index
    %c0_14 = arith.constant 0 : index
    %14 = vector.load %arg3[%c0_12, %c0_13, %c0_14] : memref<1x1x128xi32, #tpu.memory_space<vmem>>, vector<1x1x128xi32>
    %c0_i32 = arith.constant 0 : i32
    %15 = vector.broadcast %c0_i32 : i32 to vector<9x9x128xi32>
    %16 = arith.cmpi eq, %11, %15 : vector<9x9x128xi32>
    %c1_i32 = arith.constant 1 : i32
    %17 = vector.broadcast %c1_i32 : i32 to vector<1x1x128xi32>
    %18 = arith.cmpi eq, %13, %17 : vector<1x1x128xi32>
    %19 = vector.broadcast %18 : vector<1x1x128xi1> to vector<9x9x128xi1>
    %20 = arith.andi %16, %19 : vector<9x9x128xi1>
    %c8_i32 = arith.constant 8 : i32
    %21 = vector.broadcast %c8_i32 : i32 to vector<9x9x128xi32>
    %22 = arith.cmpi eq, %11, %21 : vector<9x9x128xi32>
    %c2_i32 = arith.constant 2 : i32
    %23 = vector.broadcast %c2_i32 : i32 to vector<1x1x128xi32>
    %24 = arith.cmpi eq, %13, %23 : vector<1x1x128xi32>
    %25 = vector.broadcast %24 : vector<1x1x128xi1> to vector<9x9x128xi1>
    %26 = arith.andi %22, %25 : vector<9x9x128xi1>
    %27 = arith.ori %20, %26 : vector<9x9x128xi1>
    %c0_i32_15 = arith.constant 0 : i32
    %28 = vector.broadcast %c0_i32_15 : i32 to vector<9x9x128xi32>
    %29 = arith.cmpi eq, %12, %28 : vector<9x9x128xi32>
    %c1_i32_16 = arith.constant 1 : i32
    %30 = vector.broadcast %c1_i32_16 : i32 to vector<1x1x128xi32>
    %31 = arith.cmpi eq, %14, %30 : vector<1x1x128xi32>
    %32 = vector.broadcast %31 : vector<1x1x128xi1> to vector<9x9x128xi1>
    %33 = arith.andi %29, %32 : vector<9x9x128xi1>
    %34 = arith.ori %27, %33 : vector<9x9x128xi1>
    %c8_i32_17 = arith.constant 8 : i32
    %35 = vector.broadcast %c8_i32_17 : i32 to vector<9x9x128xi32>
    %36 = arith.cmpi eq, %12, %35 : vector<9x9x128xi32>
    %c2_i32_18 = arith.constant 2 : i32
    %37 = vector.broadcast %c2_i32_18 : i32 to vector<1x1x128xi32>
    %38 = arith.cmpi eq, %14, %37 : vector<1x1x128xi32>
    %39 = vector.broadcast %38 : vector<1x1x128xi1> to vector<9x9x128xi1>
    %40 = arith.andi %36, %39 : vector<9x9x128xi1>
    %41 = arith.ori %34, %40 : vector<9x9x128xi1>
    %cst_19 = arith.constant 0.000000e+00 : f32
    %42 = vector.broadcast %cst_19 : f32 to vector<9x9x128xf32>
    %43 = arith.select %41, %42, %10 : vector<9x9x128xi1>, vector<9x9x128xf32>
    %44 = arith.truncf %43 : vector<9x9x128xf32> to vector<9x9x128xbf16>
    %c0_20 = arith.constant 0 : index
    %c0_21 = arith.constant 0 : index
    %c0_22 = arith.constant 0 : index
    %45 = vector.load %arg16[%c0_20, %c0_21, %c0_22] : memref<9x9x128xbf16, #tpu.memory_space<vmem>>, vector<9x9x128xbf16>
    tpu.vector_store %arg16[%c0_20, %c0_21, %c0_22], %44 {strides = array<i32>} : memref<9x9x128xbf16, #tpu.memory_space<vmem>>, vector<9x9x128xbf16>,
    %c0_23 = arith.constant 0 : index
    %c0_24 = arith.constant 0 : index
    %c0_25 = arith.constant 0 : index
    %46 = vector.load %arg16[%c0_23, %c0_24, %c0_25] : memref<9x9x128xbf16, #tpu.memory_space<vmem>>, vector<8x8x128xbf16>
    %c0_26 = arith.constant 0 : index
    %c1 = arith.constant 1 : index
    %c0_27 = arith.constant 0 : index
    %47 = vector.load %arg16[%c0_26, %c1, %c0_27] : memref<9x9x128xbf16, #tpu.memory_space<vmem>>, vector<8x8x128xbf16>
    %48 = tpu.concatenate %46, %47 in 2 : vector<8x8x128xbf16>, vector<8x8x128xbf16> -> vector<8x8x256xbf16>
    %49 = vector.shape_cast %48 : vector<8x8x256xbf16> to vector<64x256xbf16>
    %c0_28 = arith.constant 0 : index
    %c0_29 = arith.constant 0 : index
    %c0_30 = arith.constant 0 : index
    %50 = vector.load %arg6[%c0_28, %c0_29, %c0_30] : memref<2x256x128xbf16, #tpu.memory_space<vmem>>, vector<1x256x128xbf16>
    %51 = vector.shape_cast %50 : vector<1x256x128xbf16> to vector<256x128xbf16>
    %cst_31 = arith.constant dense<0.000000e+00> : vector<64x128xf32>
    %52 = tpu.matmul %49, %51, %cst_31 {dimension_numbers = #tpu.dot_dimension_numbers<[1], [0], [0], [1], [0, 0, 1, 1], [], []>} : vector<64x256xbf16>, vector<256x128xbf16>, vector<64x128xf32> -> vector<64x128xf32>
    %c1_32 = arith.constant 1 : index
    %c0_33 = arith.constant 0 : index
    %c0_34 = arith.constant 0 : index
    %53 = vector.load %arg16[%c1_32, %c0_33, %c0_34] : memref<9x9x128xbf16, #tpu.memory_space<vmem>>, vector<8x8x128xbf16>
    %c1_35 = arith.constant 1 : index
    %c1_36 = arith.constant 1 : index
    %c0_37 = arith.constant 0 : index
    %54 = vector.load %arg16[%c1_35, %c1_36, %c0_37] : memref<9x9x128xbf16, #tpu.memory_space<vmem>>, vector<8x8x128xbf16>
    %55 = tpu.concatenate %53, %54 in 2 : vector<8x8x128xbf16>, vector<8x8x128xbf16> -> vector<8x8x256xbf16>
    %56 = vector.shape_cast %55 : vector<8x8x256xbf16> to vector<64x256xbf16>
    %c1_38 = arith.constant 1 : index
    %c0_39 = arith.constant 0 : index
    %c0_40 = arith.constant 0 : index
    %57 = vector.load %arg6[%c1_38, %c0_39, %c0_40] : memref<2x256x128xbf16, #tpu.memory_space<vmem>>, vector<1x256x128xbf16>
    %58 = vector.shape_cast %57 : vector<1x256x128xbf16> to vector<256x128xbf16>
    %cst_41 = arith.constant dense<0.000000e+00> : vector<64x128xf32>
    %59 = tpu.matmul %56, %58, %cst_41 {dimension_numbers = #tpu.dot_dimension_numbers<[1], [0], [0], [1], [0, 0, 1, 1], [], []>} : vector<64x256xbf16>, vector<256x128xbf16>, vector<64x128xf32> -> vector<64x128xf32>
    %60 = arith.addf %52, %59 : vector<64x128xf32>
    %c0_42 = arith.constant 0 : index
    %c0_43 = arith.constant 0 : index
    %c0_44 = arith.constant 0 : index
    %61 = vector.load %arg16[%c0_42, %c0_43, %c0_44] : memref<9x9x128xbf16, #tpu.memory_space<vmem>>, vector<8x8x128xbf16>
    %62 = vector.shape_cast %61 : vector<8x8x128xbf16> to vector<64x128xbf16>
    %c0_45 = arith.constant 0 : index
    %c0_46 = arith.constant 0 : index
    %63 = vector.load %arg7[%c0_45, %c0_46] : memref<128x128xbf16, #tpu.memory_space<vmem>>, vector<128x128xbf16>
    %cst_47 = arith.constant dense<0.000000e+00> : vector<64x128xf32>
    %64 = tpu.matmul %62, %63, %cst_47 {dimension_numbers = #tpu.dot_dimension_numbers<[1], [0], [0], [1], [0, 0, 1, 1], [], []>} : vector<64x128xbf16>, vector<128x128xbf16>, vector<64x128xf32> -> vector<64x128xf32>
    %c0_48 = arith.constant 0 : index
    %c0_49 = arith.constant 0 : index
    %65 = vector.load %arg8[%c0_48, %c0_49] : memref<1x128xf32, #tpu.memory_space<vmem>>, vector<1x128xf32>
    %66 = vector.broadcast %65 : vector<1x128xf32> to vector<64x128xf32>
    %67 = arith.mulf %60, %66 : vector<64x128xf32>
    %c0_50 = arith.constant 0 : index
    %c0_51 = arith.constant 0 : index
    %68 = vector.load %arg9[%c0_50, %c0_51] : memref<1x128xf32, #tpu.memory_space<vmem>>, vector<1x128xf32>
    %69 = vector.broadcast %68 : vector<1x128xf32> to vector<64x128xf32>
    %70 = arith.addf %67, %69 : vector<64x128xf32>
    %cst_52 = arith.constant 0.000000e+00 : f32
    %71 = vector.broadcast %cst_52 : f32 to vector<64x128xf32>
    %72 = arith.maximumf %70, %71 : vector<64x128xf32>
    %73 = vector.shape_cast %72 : vector<64x128xf32> to vector<8x8x128xf32>
    %cst_53 = arith.constant 0.000000e+00 : f32
    %74 = vector.broadcast %cst_53 : f32 to vector<8x1x128xf32>
    %75 = tpu.concatenate %74, %73, %74 in 1 : vector<8x1x128xf32>, vector<8x8x128xf32>, vector<8x1x128xf32> -> vector<8x10x128xf32>
    %cst_54 = arith.constant 0.000000e+00 : f32
    %76 = vector.broadcast %cst_54 : f32 to vector<1x10x128xf32>
    %77 = tpu.concatenate %76, %75, %76 in 0 : vector<1x10x128xf32>, vector<8x10x128xf32>, vector<1x10x128xf32> -> vector<10x10x128xf32>
    %78 = arith.truncf %77 : vector<10x10x128xf32> to vector<10x10x128xbf16>
    %c0_55 = arith.constant 0 : index
    %c0_56 = arith.constant 0 : index
    %c0_57 = arith.constant 0 : index
    %79 = vector.load %arg17[%c0_55, %c0_56, %c0_57] : memref<10x10x128xbf16, #tpu.memory_space<vmem>>, vector<10x10x128xbf16>
    tpu.vector_store %arg17[%c0_55, %c0_56, %c0_57], %78 {strides = array<i32>} : memref<10x10x128xbf16, #tpu.memory_space<vmem>>, vector<10x10x128xbf16>,
    %c0_58 = arith.constant 0 : index
    %c0_59 = arith.constant 0 : index
    %c0_60 = arith.constant 0 : index
    %80 = vector.load %arg17[%c0_58, %c0_59, %c0_60] : memref<10x10x128xbf16, #tpu.memory_space<vmem>>, vector<8x8x128xbf16>
    %c0_61 = arith.constant 0 : index
    %c1_62 = arith.constant 1 : index
    %c0_63 = arith.constant 0 : index
    %81 = vector.load %arg17[%c0_61, %c1_62, %c0_63] : memref<10x10x128xbf16, #tpu.memory_space<vmem>>, vector<8x8x128xbf16>
    %c0_64 = arith.constant 0 : index
    %c2 = arith.constant 2 : index
    %c0_65 = arith.constant 0 : index
    %82 = vector.load %arg17[%c0_64, %c2, %c0_65] : memref<10x10x128xbf16, #tpu.memory_space<vmem>>, vector<8x8x128xbf16>
    %83 = tpu.concatenate %80, %81, %82 in 2 : vector<8x8x128xbf16>, vector<8x8x128xbf16>, vector<8x8x128xbf16> -> vector<8x8x384xbf16>
    %84 = vector.shape_cast %83 : vector<8x8x384xbf16> to vector<64x384xbf16>
    %c0_66 = arith.constant 0 : index
    %c0_67 = arith.constant 0 : index
    %c0_68 = arith.constant 0 : index
    %85 = vector.load %arg10[%c0_66, %c0_67, %c0_68] : memref<3x384x128xbf16, #tpu.memory_space<vmem>>, vector<1x384x128xbf16>
    %86 = vector.shape_cast %85 : vector<1x384x128xbf16> to vector<384x128xbf16>
    %cst_69 = arith.constant dense<0.000000e+00> : vector<64x128xf32>
    %87 = tpu.matmul %84, %86, %cst_69 {dimension_numbers = #tpu.dot_dimension_numbers<[1], [0], [0], [1], [0, 0, 1, 1], [], []>} : vector<64x384xbf16>, vector<384x128xbf16>, vector<64x128xf32> -> vector<64x128xf32>
    %c1_70 = arith.constant 1 : index
    %c0_71 = arith.constant 0 : index
    %c0_72 = arith.constant 0 : index
    %88 = vector.load %arg17[%c1_70, %c0_71, %c0_72] : memref<10x10x128xbf16, #tpu.memory_space<vmem>>, vector<8x8x128xbf16>
    %c1_73 = arith.constant 1 : index
    %c1_74 = arith.constant 1 : index
    %c0_75 = arith.constant 0 : index
    %89 = vector.load %arg17[%c1_73, %c1_74, %c0_75] : memref<10x10x128xbf16, #tpu.memory_space<vmem>>, vector<8x8x128xbf16>
    %c1_76 = arith.constant 1 : index
    %c2_77 = arith.constant 2 : index
    %c0_78 = arith.constant 0 : index
    %90 = vector.load %arg17[%c1_76, %c2_77, %c0_78] : memref<10x10x128xbf16, #tpu.memory_space<vmem>>, vector<8x8x128xbf16>
    %91 = tpu.concatenate %88, %89, %90 in 2 : vector<8x8x128xbf16>, vector<8x8x128xbf16>, vector<8x8x128xbf16> -> vector<8x8x384xbf16>
    %92 = vector.shape_cast %91 : vector<8x8x384xbf16> to vector<64x384xbf16>
    %c1_79 = arith.constant 1 : index
    %c0_80 = arith.constant 0 : index
    %c0_81 = arith.constant 0 : index
    %93 = vector.load %arg10[%c1_79, %c0_80, %c0_81] : memref<3x384x128xbf16, #tpu.memory_space<vmem>>, vector<1x384x128xbf16>
    %94 = vector.shape_cast %93 : vector<1x384x128xbf16> to vector<384x128xbf16>
    %cst_82 = arith.constant dense<0.000000e+00> : vector<64x128xf32>
    %95 = tpu.matmul %92, %94, %cst_82 {dimension_numbers = #tpu.dot_dimension_numbers<[1], [0], [0], [1], [0, 0, 1, 1], [], []>} : vector<64x384xbf16>, vector<384x128xbf16>, vector<64x128xf32> -> vector<64x128xf32>
    %96 = arith.addf %87, %95 : vector<64x128xf32>
    %c2_83 = arith.constant 2 : index
    %c0_84 = arith.constant 0 : index
    %c0_85 = arith.constant 0 : index
    %97 = vector.load %arg17[%c2_83, %c0_84, %c0_85] : memref<10x10x128xbf16, #tpu.memory_space<vmem>>, vector<8x8x128xbf16>
    %c2_86 = arith.constant 2 : index
    %c1_87 = arith.constant 1 : index
    %c0_88 = arith.constant 0 : index
    %98 = vector.load %arg17[%c2_86, %c1_87, %c0_88] : memref<10x10x128xbf16, #tpu.memory_space<vmem>>, vector<8x8x128xbf16>
    %c2_89 = arith.constant 2 : index
    %c2_90 = arith.constant 2 : index
    %c0_91 = arith.constant 0 : index
    %99 = vector.load %arg17[%c2_89, %c2_90, %c0_91] : memref<10x10x128xbf16, #tpu.memory_space<vmem>>, vector<8x8x128xbf16>
    %100 = tpu.concatenate %97, %98, %99 in 2 : vector<8x8x128xbf16>, vector<8x8x128xbf16>, vector<8x8x128xbf16> -> vector<8x8x384xbf16>
    %101 = vector.shape_cast %100 : vector<8x8x384xbf16> to vector<64x384xbf16>
    %c2_92 = arith.constant 2 : index
    %c0_93 = arith.constant 0 : index
    %c0_94 = arith.constant 0 : index
    %102 = vector.load %arg10[%c2_92, %c0_93, %c0_94] : memref<3x384x128xbf16, #tpu.memory_space<vmem>>, vector<1x384x128xbf16>
    %103 = vector.shape_cast %102 : vector<1x384x128xbf16> to vector<384x128xbf16>
    %cst_95 = arith.constant dense<0.000000e+00> : vector<64x128xf32>
    %104 = tpu.matmul %101, %103, %cst_95 {dimension_numbers = #tpu.dot_dimension_numbers<[1], [0], [0], [1], [0, 0, 1, 1], [], []>} : vector<64x384xbf16>, vector<384x128xbf16>, vector<64x128xf32> -> vector<64x128xf32>
    %105 = arith.addf %96, %104 : vector<64x128xf32>
    %cst_96 = arith.constant dense<0.000000e+00> : vector<128xf32>
    %106 = vector.multi_reduction <add>, %105, %cst_96 [0] : vector<64x128xf32> to vector<128xf32>
    %107 = vector.shape_cast %106 : vector<128xf32> to vector<1x128xf32>
    %cst_97 = arith.constant 6.400000e+01 : f32
    %108 = vector.broadcast %cst_97 : f32 to vector<1x128xf32>
    %109 = arith.divf %107, %108 : vector<1x128xf32>
    %c0_98 = arith.constant 0 : index
    %c0_99 = arith.constant 0 : index
    %110 = vector.load %arg11[%c0_98, %c0_99] : memref<128x128xf32, #tpu.memory_space<vmem>>, vector<128x128xf32>
    %cst_100 = arith.constant dense<0.000000e+00> : vector<1x128xf32>
    %111 = tpu.matmul %109, %110, %cst_100 {dimension_numbers = #tpu.dot_dimension_numbers<[1], [0], [0], [1], [0, 0, 1, 1], [], []>} : vector<1x128xf32>, vector<128x128xf32>, vector<1x128xf32> -> vector<1x128xf32>
    %c0_101 = arith.constant 0 : index
    %c0_102 = arith.constant 0 : index
    %112 = vector.load %arg12[%c0_101, %c0_102] : memref<1x128xf32, #tpu.memory_space<vmem>>, vector<1x128xf32>
    %113 = arith.addf %111, %112 : vector<1x128xf32>
    %cst_103 = arith.constant 0.000000e+00 : f32
    %114 = vector.broadcast %cst_103 : f32 to vector<1x128xf32>
    %115 = arith.maximumf %113, %114 : vector<1x128xf32>
    %c0_104 = arith.constant 0 : index
    %c0_105 = arith.constant 0 : index
    %116 = vector.load %arg13[%c0_104, %c0_105] : memref<128x128xf32, #tpu.memory_space<vmem>>, vector<128x128xf32>
    %cst_106 = arith.constant dense<0.000000e+00> : vector<1x128xf32>
    %117 = tpu.matmul %115, %116, %cst_106 {dimension_numbers = #tpu.dot_dimension_numbers<[1], [0], [0], [1], [0, 0, 1, 1], [], []>} : vector<1x128xf32>, vector<128x128xf32>, vector<1x128xf32> -> vector<1x128xf32>
    %c0_107 = arith.constant 0 : index
    %c0_108 = arith.constant 0 : index
    %118 = vector.load %arg14[%c0_107, %c0_108] : memref<1x128xf32, #tpu.memory_space<vmem>>, vector<1x128xf32>
    %119 = arith.addf %117, %118 : vector<1x128xf32>
    %120 = arith.negf %119 : vector<1x128xf32>
    %121 = math.exp %120 : vector<1x128xf32>
    %cst_109 = arith.constant 1.000000e+00 : f32
    %122 = vector.broadcast %cst_109 : f32 to vector<1x128xf32>
    %123 = arith.addf %122, %121 : vector<1x128xf32>
    %124 = arith.divf %122, %123 : vector<1x128xf32>
    %125 = vector.broadcast %124 : vector<1x128xf32> to vector<64x128xf32>
    %126 = arith.mulf %105, %125 : vector<64x128xf32>
    %127 = arith.addf %64, %126 : vector<64x128xf32>
    %128 = vector.shape_cast %127 : vector<64x128xf32> to vector<8x8x128xf32>
    %cst_110 = arith.constant 0.000000e+00 : f32
    %129 = vector.broadcast %cst_110 : f32 to vector<8x1x128xf32>
    %130 = tpu.concatenate %129, %128, %129 in 1 : vector<8x1x128xf32>, vector<8x8x128xf32>, vector<8x1x128xf32> -> vector<8x10x128xf32>
    %cst_111 = arith.constant 0.000000e+00 : f32
    %131 = vector.broadcast %cst_111 : f32 to vector<1x10x128xf32>
    %132 = tpu.concatenate %131, %130, %131 in 0 : vector<1x10x128xf32>, vector<8x10x128xf32>, vector<1x10x128xf32> -> vector<10x10x128xf32>
    %133 = arith.truncf %132 : vector<10x10x128xf32> to vector<10x10x128xbf16>
    %c0_112 = arith.constant 0 : index
    %c0_113 = arith.constant 0 : index
    %c0_114 = arith.constant 0 : index
    %c0_115 = arith.constant 0 : index
    %134 = vector.load %arg15[%c0_112, %c0_113, %c0_114, %c0_115] : memref<1x10x10x128xbf16, #tpu.memory_space<vmem>>, vector<1x10x10x128xbf16>
    %135 = vector.shape_cast %134 : vector<1x10x10x128xbf16> to vector<10x10x128xbf16>
    %136 = vector.shape_cast %133 : vector<10x10x128xbf16> to vector<1x10x10x128xbf16>
    tpu.vector_store %arg15[%c0_112, %c0_113, %c0_114, %c0_115], %136 {strides = array<i32>} : memref<1x10x10x128xbf16, #tpu.memory_space<vmem>>, vector<1x10x10x128xbf16>,
    return
  }
  func.func @transform_0(%arg0: i32) -> (i32, i32, i32, i32) {
    %c0_i32 = arith.constant 0 : i32
    %c0_i32_0 = arith.constant 0 : i32
    %c0_i32_1 = arith.constant 0 : i32
    %c0_i32_2 = arith.constant 0 : i32
    return %arg0, %c0_i32, %c0_i32_0, %c0_i32_1 : i32, i32, i32, i32
  }
  func.func @transform_1(%arg0: i32) -> (i32, i32, i32) {
    %c0_i32 = arith.constant 0 : i32
    %c0_i32_0 = arith.constant 0 : i32
    %c0_i32_1 = arith.constant 0 : i32
    %c0_i32_2 = arith.constant 0 : i32
    return %c0_i32, %c0_i32_0, %c0_i32_1 : i32, i32, i32
  }
  func.func @transform_2(%arg0: i32) -> (i32, i32, i32) {
    %c0_i32 = arith.constant 0 : i32
    %c0_i32_0 = arith.constant 0 : i32
    %c0_i32_1 = arith.constant 0 : i32
    %c0_i32_2 = arith.constant 0 : i32
    return %c0_i32, %c0_i32_0, %c0_i32_1 : i32, i32, i32
  }
  func.func @transform_3(%arg0: i32) -> (i32, i32, i32) {
    %c0_i32 = arith.constant 0 : i32
    %c0_i32_0 = arith.constant 0 : i32
    %c0_i32_1 = arith.constant 0 : i32
    %c0_i32_2 = arith.constant 0 : i32
    return %c0_i32, %c0_i32_0, %c0_i32_1 : i32, i32, i32
  }
  func.func @transform_4(%arg0: i32) -> (i32, i32, i32) {
    %c0_i32 = arith.constant 0 : i32
    %c0_i32_0 = arith.constant 0 : i32
    %c0_i32_1 = arith.constant 0 : i32
    %c0_i32_2 = arith.constant 0 : i32
    return %c0_i32, %c0_i32_0, %c0_i32_1 : i32, i32, i32
  }
  func.func @transform_5(%arg0: i32) -> (i32, i32, i32) {
    %c0_i32 = arith.constant 0 : i32
    %c0_i32_0 = arith.constant 0 : i32
    %c0_i32_1 = arith.constant 0 : i32
    %c0_i32_2 = arith.constant 0 : i32
    return %c0_i32, %c0_i32_0, %c0_i32_1 : i32, i32, i32
  }
  func.func @transform_6(%arg0: i32) -> (i32, i32) {
    %c0_i32 = arith.constant 0 : i32
    %c0_i32_0 = arith.constant 0 : i32
    %c0_i32_1 = arith.constant 0 : i32
    return %c0_i32, %c0_i32_0 : i32, i32
  }
  func.func @transform_7(%arg0: i32) -> (i32, i32) {
    %c0_i32 = arith.constant 0 : i32
    %c0_i32_0 = arith.constant 0 : i32
    %c0_i32_1 = arith.constant 0 : i32
    return %c0_i32, %c0_i32_0 : i32, i32
  }
  func.func @transform_8(%arg0: i32) -> (i32, i32) {
    %c0_i32 = arith.constant 0 : i32
    %c0_i32_0 = arith.constant 0 : i32
    %c0_i32_1 = arith.constant 0 : i32
    return %c0_i32, %c0_i32_0 : i32, i32
  }
  func.func @transform_9(%arg0: i32) -> (i32, i32, i32) {
    %c0_i32 = arith.constant 0 : i32
    %c0_i32_0 = arith.constant 0 : i32
    %c0_i32_1 = arith.constant 0 : i32
    %c0_i32_2 = arith.constant 0 : i32
    return %c0_i32, %c0_i32_0, %c0_i32_1 : i32, i32, i32
  }
  func.func @transform_10(%arg0: i32) -> (i32, i32) {
    %c0_i32 = arith.constant 0 : i32
    %c0_i32_0 = arith.constant 0 : i32
    %c0_i32_1 = arith.constant 0 : i32
    return %c0_i32, %c0_i32_0 : i32, i32
  }
  func.func @transform_11(%arg0: i32) -> (i32, i32) {
    %c0_i32 = arith.constant 0 : i32
    %c0_i32_0 = arith.constant 0 : i32
    %c0_i32_1 = arith.constant 0 : i32
    return %c0_i32, %c0_i32_0 : i32, i32
  }
  func.func @transform_12(%arg0: i32) -> (i32, i32) {
    %c0_i32 = arith.constant 0 : i32
    %c0_i32_0 = arith.constant 0 : i32
    %c0_i32_1 = arith.constant 0 : i32
    return %c0_i32, %c0_i32_0 : i32, i32
  }
  func.func @transform_13(%arg0: i32) -> (i32, i32) {
    %c0_i32 = arith.constant 0 : i32
    %c0_i32_0 = arith.constant 0 : i32
    %c0_i32_1 = arith.constant 0 : i32
    return %c0_i32, %c0_i32_0 : i32, i32
  }
  func.func @transform_14(%arg0: i32) -> (i32, i32, i32, i32) {
    %c0_i32 = arith.constant 0 : i32
    %c0_i32_0 = arith.constant 0 : i32
    %c0_i32_1 = arith.constant 0 : i32
    %c0_i32_2 = arith.constant 0 : i32
    return %arg0, %c0_i32, %c0_i32_0, %c0_i32_1 : i32, i32, i32, i32
  }
}

</mosaic_0001>

<bundles_post_ra>
// kernel: tpu_custom_call.1
= control target key start
LH: loop header
LB: loop body
LE: loop exit
PB: predicated region body
PF: predicated region fallthrough
CT: control target
= control target key end

     0   :  { %s6082_s0 = inlined_call_operand.vmem [shape: bf16[2,9,9,128], index: 0, kind: input, shape index: {}]   ;;  %s6083_s1 = inlined_call_operand.vmem [shape: s32[1,1,128], index: 1, kind: input, shape index: {}]   ;;  %s6084_s2 = inlined_call_operand.vmem [shape: s32[1,1,128], index: 2, kind: input, shape index: {}]   ;;  %s6085_s3 = inlined_call_operand.vmem [shape: f32[1,1,128], index: 3, kind: input, shape index: {}]   ;;  %s6086_s4 = inlined_call_operand.hbm [shape: f32[1,1,128], index: 4, kind: input, shape index: {}]   ;;  %s6087_s5 = inlined_call_operand.hbm [shape: bf16[2,256,128], index: 5, kind: input, shape index: {}]   ;;  %s6088_s6 = inlined_call_operand.hbm [shape: bf16[128,128], index: 6, kind: input, shape index: {}]   ;;  %s6089_s7 = inlined_call_operand.hbm [shape: f32[1,128], index: 7, kind: input, shape index: {}]   ;;  %s6090_s8 = inlined_call_operand.hbm [shape: f32[1,128], index: 8, kind: input, shape index: {}]   ;;  %s6091_s9 = inlined_call_operand.hbm [shape: bf16[3,384,128], index: 9, kind: input, shape index: {}]   ;;  %s6092_s10 = inlined_call_operand.vmem [shape: f32[128,128], index: 10, kind: input, shape index: {}]   ;;  %s6093_s11 = inlined_call_operand.vmem [shape: f32[1,128], index: 11, kind: input, shape index: {}]   ;;  %s6094_s12 = inlined_call_operand.vmem [shape: f32[128,128], index: 12, kind: input, shape index: {}]   ;;  %s6095_s13 = inlined_call_operand.vmem [shape: f32[1,128], index: 13, kind: input, shape index: {}]   ;;  %s6096_s14 = inlined_call_operand.vmem [shape: bf16[2,10,10,128], index: 14, kind: output, shape index: {}]  }
   0x1   :  { %6101 = sst [smem:[#allocation19_spill]] %s6093_s11 }
   0x2   :  { %6102 = sst [smem:[#allocation20_spill]] %s6094_s12 }
   0x3   :  { %6103 = sst [smem:[#allocation21_spill]] %s6095_s13 }
   0x4   :  { %19 = vsyncpa [#allocation5], 0 }
   0x5   :  { %20 = vsyncpa [#allocation7], 0 }
   0x6   :  { %21 = vsyncpa [#allocation10], 0 }
   0x7   :  { %22 = vsyncpa [#allocation13], 0  ;;  %s5253_s29 = smov 0  }
   0x8 LB: > { %6104 = sst [smem:[#allocation18_spill]] %s5164_s29  ;;  %s5166_s30 = smov [#allocation6]   ;;  %s5164_s29 = sphi %s5253_s29, %s28_s29  }
   0x9   : > { %s390_s15 = sshll.u32 %s5166_s30, 4  ;;  %s5259_s16 = sadd.s32 4294967295, %s5164_s29   ;;  %s5264_s15 = int_to_ptr.vmem [resolvable:$true] %s390_s15 }
   0xa   : > { %p3807_p0 = scmp.ge.s32.totalorder %s5164_s29, 1  ;;  %p358_p1 = scmp.lt.s32.totalorder %s5164_s29, 3 }
   0xb   : > { %p6099_p2 = scmp.eq.s32.totalorder %s5259_s16, 0  ;;  %s5167_s18 = smov [#allocation9]  }
   0xc   : > { %p5266_p3 = pnand %p3807_p0, %p358_p1  ;;  %s417_s19 = sshll.u32 %s5167_s18, 4  ;;  %s5272_s19 = int_to_ptr.vmem [resolvable:$true] %s417_s19 }
   0xd   : > { %s5168_s21 = smov [#allocation4]   ;;  %s5169_s23 = smov [#allocation8]  }
   0xe   : > { %s6105_s17 = scalar_select %p5266_p3, 1, 0 }
   0xf   : > { %p4723_p4 = pneg %p5266_p3  ;;  %s380_s22 = sshll.u32 %s5168_s21, 4  ;;  %s5280_s22 = int_to_ptr.vmem [resolvable:$true] %s380_s22 }
  0x10   : > { %s5282_s24 = sshll.u32 %s5169_s23, 4  ;;  %s4974_s27 = scalar_lea.hbm %s6087_s5, 4096  ;;  %s404_s24 = int_to_ptr.vmem [resolvable:$true] %s5282_s24 }
  0x11   : > { %p5276_p5 = pnand %p6099_p2, %p4723_p4  ;;  %p4975_p6 = scmp.ne.s32.totalorder %s6087_s5, %s4974_s27 }
  0x12   : > { %p4981_p10 = scmp.lt.u32.totalorder %s4974_s27, %s6087_s5 }
  0x13   : > { %p5292_p7 = pneg %p5276_p5 }
  0x15   : > { %p4977_p8 = pnand %p5292_p7, %p4975_p6 }
  0x17   : > { %p4978_p9 = pneg %p4977_p8 }
  0x19   : > { %p4983_p11 = pnand %p4981_p10, %p4978_p9 }
  0x1b   : > { %4986 = shalt.err (!%p4983_p11)
}
  0x1c   : > { %s4987_s25 = scalar_lea.vmem %s5264_s15, 4096  ;;  %p4995_p1 = scmp.lt.s32.totalorder %s5264_s15, %s5264_s15 }
  0x1d   : > { %p4988_p12 = scmp.ne.s32.totalorder %s5264_s15, %s4987_s25  ;;  %p4996_p4 = scmp.lt.s32.totalorder %s4987_s25, %s4987_s25 }
  0x1f   : > { %p4990_p13 = pnand %p4988_p12, %p5292_p7  ;;  %p4997_p6 = por %p4996_p4, %p4995_p1 }
  0x21   : > { %p4991_p0 = pneg %p4990_p13 }
  0x23   : > { %p4998_p8 = pnand %p4997_p6, %p4991_p0 }
  0x25   : > { %5001 = shalt.err (!%p4998_p8)
}
  0x26   : > { %s5170_s26 = smov 64   ;;  %s5171_s27 = smov 4  }
  0x27   : > { %4729 = dma.hbm_to_vmem [thread:$0]  (!%p5276_p5), %s6087_s5, 4096, %s5264_s15, [#allocation7], %s5170_s26, %s5170_s26, %s5171_s27  }
  0x28   : > { %s5002_s25 = scalar_lea.hbm %s6089_s7, 16 }
  0x29   : > { %p5003_p9 = scmp.ne.s32.totalorder %s6089_s7, %s5002_s25  ;;  %p5009_p12 = scmp.lt.u32.totalorder %s5002_s25, %s6089_s7 }
  0x2b   : > { %p5005_p10 = pnand %p5003_p9, %p5292_p7 }
  0x2d   : > { %p5006_p11 = pneg %p5005_p10 }
  0x2f   : > { %p5011_p13 = pnand %p5009_p12, %p5006_p11 }
  0x31   : > { %5014 = shalt.err (!%p5011_p13)
}
  0x32   : > { %s5015_s15 = scalar_lea.vmem %s5272_s19, 16  ;;  %s5022_s13 = scalar_lea.vmem %s5272_s19, 32 }
  0x33   : > { %p5016_p0 = scmp.ne.s32.totalorder %s5272_s19, %s5015_s15  ;;  %p5023_p6 = scmp.lt.s32.totalorder %s5272_s19, %s5272_s19 }
  0x34   : > { %p5024_p8 = scmp.lt.s32.totalorder %s5022_s13, %s5015_s15 }
  0x35   : > { %p5018_p1 = pnand %p5016_p0, %p5292_p7 }
  0x36   : > { %p5025_p9 = por %p5024_p8, %p5023_p6 }
  0x37   : > { %p5019_p4 = pneg %p5018_p1 }
  0x39   : > { %p5026_p10 = pnand %p5025_p9, %p5019_p4 }
  0x3b   : > { %5029 = shalt.err (!%p5026_p10)
}
  0x3c   : > { %4735 = dma.hbm_to_vmem [thread:$0]  (!%p5276_p5), %s6089_s7, 16, %s5272_s19, [#allocation10]  }
  0x3d   : > { %s5030_s30 = scalar_lea.hbm %s6086_s4, 16 }
  0x3e   : > { %p5031_p11 = scmp.ne.s32.totalorder %s6086_s4, %s5030_s30  ;;  %p5037_p0 = scmp.lt.u32.totalorder %s5030_s30, %s6086_s4 }
  0x40   : > { %p5033_p12 = pnand %p5031_p11, %p5292_p7 }
  0x42   : > { %p5034_p13 = pneg %p5033_p12 }
  0x44   : > { %p5039_p1 = pnand %p5037_p0, %p5034_p13 }
  0x46   : > { %5042 = shalt.err (!%p5039_p1)
}
  0x47   : > { %s5043_s19 = scalar_lea.vmem %s5280_s22, 16  ;;  %s5050_s13 = scalar_lea.vmem %s5280_s22, 32 }
  0x48   : > { %p5044_p4 = scmp.ne.s32.totalorder %s5280_s22, %s5043_s19  ;;  %p5051_p9 = scmp.lt.s32.totalorder %s5280_s22, %s5280_s22 }
  0x49   : > { %p5052_p10 = scmp.lt.s32.totalorder %s5050_s13, %s5043_s19 }
  0x4a   : > { %p5046_p6 = pnand %p5044_p4, %p5292_p7 }
  0x4b   : > { %p5053_p11 = por %p5052_p10, %p5051_p9 }
  0x4c   : > { %p5047_p8 = pneg %p5046_p6 }
  0x4e   : > { %p5054_p12 = pnand %p5053_p11, %p5047_p8 }
  0x50   : > { %5057 = shalt.err (!%p5054_p12)
}
  0x51   : > { %4726 = dma.hbm_to_vmem [thread:$0]  (!%p5276_p5), %s6086_s4, 16, %s5280_s22, [#allocation5]  }
  0x52   : > { %s5058_s30 = scalar_lea.hbm %s6088_s6, 1024 }
  0x53   : > { %p5059_p13 = scmp.ne.s32.totalorder %s6088_s6, %s5058_s30  ;;  %p5065_p4 = scmp.lt.u32.totalorder %s5058_s30, %s6088_s6 }
  0x55   : > { %p5061_p0 = pnand %p5059_p13, %p5292_p7 }
  0x57   : > { %p5062_p1 = pneg %p5061_p0 }
  0x59   : > { %p5067_p6 = pnand %p5065_p4, %p5062_p1 }
  0x5b   : > { %5070 = shalt.err (!%p5067_p6)
}
  0x5c   : > { %s5071_s19 = scalar_lea.vmem %s404_s24, 1024  ;;  %p5079_p11 = scmp.lt.s32.totalorder %s404_s24, %s404_s24 }
  0x5d   : > { %p5072_p8 = scmp.ne.s32.totalorder %s404_s24, %s5071_s19  ;;  %p5080_p12 = scmp.lt.s32.totalorder %s5071_s19, %s5071_s19 }
  0x5f   : > { %p5074_p9 = pnand %p5072_p8, %p5292_p7  ;;  %p5081_p2 = por %p5080_p12, %p5079_p11 }
  0x61   : > { %p5075_p10 = pneg %p5074_p9 }
  0x63   : > { %p5082_p3 = pnand %p5081_p2, %p5075_p10 }
  0x65   : > { %5085 = shalt.err (!%p5082_p3)
}
  0x66   : > { %4732 = dma.hbm_to_vmem [thread:$0]  (!%p5276_p5), %s6088_s6, 1024, %s404_s24, [#allocation7], %s5170_s26, %s5170_s26, %s5171_s27  }
  0x67   : > { %s5172_s11 = smov [#allocation11]   ;;  %s5173_s29 = smov [#allocation12]  }
  0x68   : > { %s428_s12 = sshll.u32 %s5172_s11, 4  ;;  %s438_s28 = sshll.u32 %s5173_s29, 4  ;;  %s429_s12 = int_to_ptr.vmem [resolvable:$true] %s428_s12  ;;  %s439_s28 = int_to_ptr.vmem [resolvable:$true] %s438_s28 }
  0x69   : > { %s5086_s23 = scalar_lea.hbm %s6090_s8, 16 }
  0x6a   : > { %p5087_p2 = scmp.ne.s32.totalorder %s6090_s8, %s5086_s23  ;;  %p5093_p0 = scmp.lt.u32.totalorder %s5086_s23, %s6090_s8 }
  0x6c   : > { %p5089_p3 = pnand %p5087_p2, %p5292_p7 }
  0x6e   : > { %p5090_p13 = pneg %p5089_p3 }
  0x70   : > { %p5095_p1 = pnand %p5093_p0, %p5090_p13 }
  0x72   : > { %5098 = shalt.err (!%p5095_p1)
}
  0x73   : > { %s5099_s24 = scalar_lea.vmem %s429_s12, 16  ;;  %s5106_s13 = scalar_lea.vmem %s429_s12, 32 }
  0x74   : > { %p5100_p4 = scmp.ne.s32.totalorder %s429_s12, %s5099_s24  ;;  %p5107_p9 = scmp.lt.s32.totalorder %s429_s12, %s429_s12 }
  0x75   : > { %p5108_p10 = scmp.lt.s32.totalorder %s5106_s13, %s5099_s24 }
  0x76   : > { %p5102_p6 = pnand %p5100_p4, %p5292_p7 }
  0x77   : > { %p5109_p11 = por %p5108_p10, %p5107_p9 }
  0x78   : > { %p5103_p8 = pneg %p5102_p6 }
  0x7a   : > { %p5110_p12 = pnand %p5109_p11, %p5103_p8 }
  0x7c   : > { %5113 = shalt.err (!%p5110_p12)
}
  0x7d   : > { %4738 = dma.hbm_to_vmem [thread:$0]  (!%p5276_p5), %s6090_s8, 16, %s429_s12, [#allocation10]  }
  0x7e   : > { %s5114_s23 = scalar_lea.hbm %s6091_s9, 9216 }
  0x7f   : > { %p5115_p2 = scmp.ne.s32.totalorder %s6091_s9, %s5114_s23  ;;  %p5121_p0 = scmp.lt.u32.totalorder %s5114_s23, %s6091_s9 }
  0x81   : > { %p5117_p3 = pnand %p5115_p2, %p5292_p7 }
  0x83   : > { %p5118_p13 = pneg %p5117_p3 }
  0x85   : > { %p5123_p1 = pnand %p5121_p0, %p5118_p13 }
  0x87   : > { %5126 = shalt.err (!%p5123_p1)
}
  0x88   : > { %s5127_s24 = scalar_lea.vmem %s439_s28, 9216  ;;  %p5135_p9 = scmp.lt.s32.totalorder %s439_s28, %s439_s28 }
  0x89   : > { %p5128_p4 = scmp.ne.s32.totalorder %s439_s28, %s5127_s24  ;;  %p5136_p10 = scmp.lt.s32.totalorder %s5127_s24, %s5127_s24 }
  0x8b   : > { %p5130_p6 = pnand %p5128_p4, %p5292_p7  ;;  %p5137_p11 = por %p5136_p10, %p5135_p9 }
  0x8d   : > { %p5131_p8 = pneg %p5130_p6 }
  0x8f   : > { %p5138_p12 = pnand %p5137_p11, %p5131_p8 }
  0x91   : > { %5141 = shalt.err (!%p5138_p12)
}
  0x92   : > { %4741 = dma.hbm_to_vmem [thread:$0]  (!%p5276_p5), %s6091_s9, 9216, %s439_s28, [#allocation13], %s5170_s26, %s5170_s26, %s5171_s27  }
  0x93   : > { %p6108_p2 = scmp.ne.s32.totalorder %s6105_s17, 0 }
  0x94   : > { %p6109_p7 = scmp.eq.s32.totalorder (!%p6108_p2), %s5259_s16, 0 }
  0x95   : > { %474 = sbr.rel (%p6108_p2) target bundleno = 1302 (0x516), region = 76 }
  0x9c   : > { %5147 = dma.done.wait (%p6109_p7), [#allocation5], 16   ;;  %p6110_p3 = pmov %p6109_p7 }
  0x9e   : > { %5149 = vsyncadd (%p6110_p3), [#allocation5], 4294967280  ;;  %p6111_p13 = pmov %p6110_p3 }
  0x9f   : > { %p6112_p0 = pmov %p6110_p3 }
  0xa0   : > { %5151 = dma.done.wait (%p6111_p13), [#allocation7], 5120  }
  0xa1   : > { %5153 = vsyncadd (%p6112_p0), [#allocation7], 4294962176  ;;  %p6113_p1 = pmov %p6112_p0 }
  0xa2   : > { %p6114_p5 = pmov %p6112_p0 }
  0xa3   : > { %5155 = dma.done.wait (%p6113_p1), [#allocation10], 32  }
  0xa4   : > { %5157 = vsyncadd (%p6114_p5), [#allocation10], 4294967264  ;;  %p6115_p4 = pmov %p6112_p0 }
  0xa5   : > { %p6116_p6 = pmov %p6112_p0 }
  0xa6   : > { %5159 = dma.done.wait (%p6115_p4), [#allocation13], 9216  }
  0xa7   : > { %5161 = vsyncadd (%p6116_p6), [#allocation13], 4294958080  ;;  %v4774_v0 = vld [vmem:[#allocation6 + $0xc0] sm:$0xff]   ;;  %p540_p8 = scmp.lt.s32.totalorder %s5259_s16, 1  ;;  %v4776_v2 = vld [vmem:[#allocation6 + $0xc8] sm:$0xff]   ;;  %v655_v7 = vlaneseq  ;;  %vm806_vm0 = vcmask 1040384  }
  0xa8   : > { %v4775_v1 = vld [vmem:[#allocation6 + $0x80] sm:$0xff]   ;;  %4161 = vmatprep.subr.bf16.mxu1 %v4774_v0  ;;  %v4777_v3 = vld [vmem:[#allocation6 + $0x88] sm:$0xff]   ;;  %v4778_v4 = vld [vmem:[#allocation6 + $0xd0] sm:$0xff]   ;;  %vm807_vm1 = vsmask.f32 256  ;;  %v5174_v31 = vmov 0  }
  0xa9   : > { %4162 = vmatpush3.bf16.msra.mxu1 %v4775_v1  ;;  %s6132_s16 = smov (!%p540_p8, %s5259_s16), 1  ;;  %v4779_v5 = vld [vmem:[#allocation6 + $0x90] sm:$0xff]   ;;  %v4780_v6 = vld [vmem:[#allocation6 + $0xd8] sm:$0xff]   ;;  %v4782_v9 = vld [vmem:[#allocation6 + $0xe0] sm:$0xff]   ;;  %v656_v10 = vshrl.u32 %v655_v7, 7  ;;  %s6127_s13 = sld [smem:[#allocation20_spill]] }
  0xaa   : > { %4163 = vmatprep.subr.bf16.mxu1 %v4776_v2  ;;  %s4697_s17 = smul.u32 72, %s6132_s16  ;;  %v4781_v8 = vld [vmem:[#allocation6 + $0x98] sm:$0xff]   ;;  %v4783_v11 = vld [vmem:[#allocation6 + $0xa0] sm:$0xff]   ;;  %v4784_v12 = vld [vmem:[#allocation6 + $0xe8] sm:$0xff]  }
  0xab   : > { %v657_v13 = vadd.s32 8, %v656_v10  ;;  %v5459_v21 = vld [vmem:[%s6085_s3] ss:$0 sm:$0xff]  ;;  %v4785_v23 = vld [vmem:[#allocation6 + $0xa8] sm:$0xff]   ;;  %v5464_v24 = vld [vmem:[#allocation4] ss:$0 sm:$0xff] }
  0xac   : > { %s5451_s26 = scalar_lea.vmem %s6082_s0, %s4697_s17  ;;  %v659_v22 = vld [vmem:[%s6084_s2] sm:$0x1]  ;;  %v5466_v25 = vsub.s32 0, %v656_v10  ;;  %v4786_v26 = vld [vmem:[#allocation6 + $0xf0] sm:$0xff]   ;;  %vm681_vm4 = vcmp.eq.s32.totalorder %v656_v10, 0  ;;  %v4788_v41 = vld [vmem:[#allocation6 + $0xf8] sm:$0xff]  }
  0xad   : > { %4164 = vmatpush3.bf16.msra.mxu1 %v4777_v3  ;;  %v553_v14 = vld [vmem:[%s5451_s26 + $0x8] ss:$8 sps:$4 sm:$0xff]   ;;  %v554_v15 = vld [vmem:[%s5451_s26 + $0xc] sm:$0x1]  ;;  %v556_v16 = vld [vmem:[%s5451_s26 + $0x14] sm:$0x1] }
  0xae   : > { %4165 = vmatprep.subr.bf16.mxu1 %v4778_v4  ;;  %v571_v17 = vunpack.c.l.bf16 %v553_v14  ;;  %v572_v18 = vunpack.c.l.bf16 %v554_v15  ;;  %v573_v19 = vunpack.c.h.bf16 %v553_v14  ;;  %v574_v20 = vunpack.c.l.bf16 %v556_v16  ;;  %v4787_v40 = vld [vmem:[#allocation6 + $0xb0] sm:$0xff]   ;;  %v557_v46 = vld [vmem:[%s5451_s26 + $0x18] ss:$8 sps:$4 sm:$0xff]   ;;  %v558_v47 = vld [vmem:[%s5451_s26 + $0x1c] sm:$0x1]  ;;  %s4698_s23 = smul.u32 80, %s6132_s16 }
  0xaf   : > { %vm683_vm2 = vcmp.eq.s32.totalorder %v659_v22, 1  ;;  %vm700_vm3 = vcmp.eq.s32.totalorder %v659_v22, 2  ;;  %vm699_vm5 = vcmp.eq.s32.totalorder %v657_v13, 8  ;;  %v4789_v48 = vld [vmem:[#allocation6 + $0xb8] sm:$0xff]   ;;  %v813_v50 = vld [vmem:[#allocation2 + $0xc] sm:$0x1]  ;;  %v575_v52 = vunpack.c.l.bf16 %v557_v46  ;;  %vm5503_vm10 = vmand %vm806_vm0, %vm807_vm1 }
  0xb0   : > { %v596_v27 = vmul.f32 %v5459_v21, %v571_v17  ;;  %v597_v28 = vmul.f32 %v5459_v21, %v572_v18  ;;  %v598_v29 = vmul.f32 %v5459_v21, %v573_v19  ;;  %v599_v30 = vmul.f32 %v5459_v21, %v574_v20  ;;  %v560_v51 = vld [vmem:[%s5451_s26 + $0x24] sm:$0x1]  ;;  %v817_v58 = vld [vmem:[#allocation2 + $0x14] sm:$0x1]  ;;  %v4793_v3 = vld [vmem:[#allocation6 + $0x40] sm:$0xff]   ;;  %s5715_s19 = scalar_lea.vmem %s6096_s14, %s4698_s23  ;;  %s6128_s23 = sld [smem:[#allocation19_spill]] }
  0xb1   : > { %4166 = vmatpush3.bf16.msra.mxu1 %v4779_v5  ;;  %v684_v32 = vsel %vm683_vm2, 1, %v5174_v31  ;;  %v701_v33 = vsel %vm700_vm3, 1, %v5174_v31  ;;  %v576_v53 = vunpack.c.l.bf16 %v558_v47  ;;  %v577_v54 = vunpack.c.h.bf16 %v557_v46  ;;  %v562_v15 = vld [vmem:[%s5451_s26 + $0x2c] sm:$0x1]  ;;  %v564_v16 = vld [vmem:[%s5451_s26 + $0x34] sm:$0x1] }
  0xb2   : > { %4167 = vmatprep.subr.bf16.mxu1 %v4780_v6  ;;  %v621_v34 = vadd.f32 %v5464_v24, %v596_v27  ;;  %v622_v35 = vadd.f32 %v5464_v24, %v597_v28  ;;  %v623_v36 = vadd.f32 %v5464_v24, %v598_v29  ;;  %v624_v37 = vadd.f32 %v5464_v24, %v599_v30  ;;  %v821_v22 = vld [vmem:[#allocation2 + $0x1c] sm:$0x1]  ;;  %v825_v29 = vld [vmem:[#allocation2 + $0x24] sm:$0x1]  ;;  %s6129_s16 = sld [smem:[#allocation21_spill]] }
  0xb3   : > { %v688_v38 = vrot.slane %v684_v32, %v5466_v25  ;;  %v705_v39 = vrot.slane %v701_v33, %v5466_v25  ;;  %v578_v59 = vunpack.c.l.bf16 %v560_v51  ;;  %v600_v4 = vmul.f32 %v5459_v21, %v575_v52  ;;  %v4810_v49 = vld [vmem:[#allocation6 + $0x28] sm:$0xff]  }
  0xb4   : > { %v639_v42 = vmax.f32 %v621_v34, 0.0  ;;  %v640_v43 = vmax.f32 %v622_v35, 0.0  ;;  %v641_v44 = vmax.f32 %v623_v36, 0.0  ;;  %v642_v45 = vmax.f32 %v624_v37, 0.0 }
  0xb5   : > { %4168 = vmatpush3.bf16.msra.mxu1 %v4781_v8  ;;  %vm689_vm6 = vcmp.eq.s32.totalorder %v688_v38, 1  ;;  %vm706_vm7 = vcmp.eq.s32.totalorder %v705_v39, 1  ;;  %v601_v5 = vmul.f32 %v5459_v21, %v576_v53  ;;  %v602_v6 = vmul.f32 %v5459_v21, %v577_v54 }
  0xb6   : > { %4169 = vmatprep.subr.bf16.mxu1 %v4782_v9  ;;  %vm5483_vm8 = vmand %vm681_vm4, %vm689_vm6  ;;  %v603_v7 = vmul.f32 %v5459_v21, %v578_v59  ;;  %v625_v10 = vadd.f32 %v5464_v24, %v600_v4  ;;  %vm5176_vm4 = vmmov 0  }
  0xb7   : > { %vm5489_vm9 = vmand %vm699_vm5, %vm706_vm7  ;;  %v717_v56 = vsel %vm5483_vm8, 0.0, %v639_v42  ;;  %v719_v57 = vsel %vm5483_vm8, 0.0, %v641_v44  ;;  %v627_v13 = vadd.f32 %v5464_v24, %v602_v6 }
  0xb8   : > { %v718_v60 = vsel %vm5489_vm9, 0.0, %v640_v43  ;;  %v720_v61 = vsel %vm5489_vm9, 0.0, %v642_v45  ;;  %v4113_v62 = vpack.c.bf16 %v717_v56, %v717_v56  ;;  %v4115_v63 = vpack.c.bf16 %v719_v57, %v719_v57 }
  0xb9   : > { %4170 = vmatpush3.bf16.msra.mxu1 %v4783_v11  ;;  %v4114_v1 = vpack.c.bf16 %v718_v60, %v718_v60  ;;  %v4116_v2 = vpack.c.bf16 %v720_v61, %v720_v61  ;;  %v626_v11 = vadd.f32 %v5464_v24, %v601_v5  ;;  %v628_v14 = vadd.f32 %v5464_v24, %v603_v7  ;;  %v565_v61 = vld [vmem:[%s5451_s26 + $0x38] ss:$8 sps:$4 sm:$0xff]  }
  0xba   : > { %4171 = vmatprep.subr.bf16.mxu1 %v4784_v12  ;;  %812 = vst [vmem:[#allocation2 + $0x8] sm:$0xf] %v4113_v62  ;;  %816 = vst [vmem:[#allocation2 + $0x10] sm:$0xf] %v4115_v63  ;;  %v561_v12 = vld [vmem:[%s5451_s26 + $0x28] ss:$8 sps:$4 sm:$0xff]  }
  0xbb   : > { %v814_v8 = vsel %vm5503_vm10, %v4114_v1, %v813_v50  ;;  %v818_v9 = vsel %vm5503_vm10, %v4116_v2, %v817_v58  ;;  %v579_v17 = vunpack.c.l.bf16 %v561_v12  ;;  %v581_v18 = vunpack.c.h.bf16 %v561_v12  ;;  %v566_v62 = vld [vmem:[%s5451_s26 + $0x3c] sm:$0x1]  ;;  %v829_v2 = vld [vmem:[#allocation2 + $0x2c] sm:$0x1] }
  0xbc   : > { %815 = vst [vmem:[#allocation2 + $0xc] sm:$0x1] %v814_v8  ;;  %819 = vst [vmem:[#allocation2 + $0x14] sm:$0x1] %v818_v9  ;;  %v643_v19 = vmax.f32 %v625_v10, 0.0  ;;  %v644_v20 = vmax.f32 %v626_v11, 0.0  ;;  %v584_v4 = vunpack.c.l.bf16 %v566_v62 }
  0xbd   : > { %4172 = vmatpush3.bf16.msra.mxu1 %v4785_v23  ;;  %v580_v23 = vunpack.c.l.bf16 %v562_v15  ;;  %v645_v27 = vmax.f32 %v627_v13, 0.0  ;;  %v646_v28 = vmax.f32 %v628_v14, 0.0  ;;  %v604_v30 = vmul.f32 %v5459_v21, %v579_v17  ;;  %v568_v9 = vld [vmem:[%s5451_s26 + $0x44] sm:$0x1]  ;;  %v833_v14 = vld [vmem:[#allocation2 + $0x34] sm:$0x1] }
  0xbe   : > { %4173 = vmatprep.subr.bf16.mxu1 %v4786_v26  ;;  %v582_v26 = vunpack.c.l.bf16 %v564_v16  ;;  %v606_v32 = vmul.f32 %v5459_v21, %v581_v18  ;;  %v721_v33 = vsel %vm5483_vm8, 0.0, %v643_v19  ;;  %v722_v34 = vsel %vm5489_vm9, 0.0, %v644_v20  ;;  %v552_v62 = vld [vmem:[%s5451_s26 + $0x4] sm:$0x1] }
  0xbf   : > { %v605_v35 = vmul.f32 %v5459_v21, %v580_v23  ;;  %v723_v37 = vsel %vm5483_vm8, 0.0, %v645_v27  ;;  %v724_v38 = vsel %vm5489_vm9, 0.0, %v646_v28  ;;  %v4117_v39 = vpack.c.bf16 %v721_v33, %v721_v33 }
  0xc0   : > { %v607_v36 = vmul.f32 %v5459_v21, %v582_v26  ;;  %v4119_v43 = vpack.c.bf16 %v723_v37, %v723_v37  ;;  %v4120_v44 = vpack.c.bf16 %v724_v38, %v724_v38  ;;  %v629_v45 = vadd.f32 %v5464_v24, %v604_v30 }
  0xc1   : > { %4174 = vmatpush3.bf16.msra.mxu1 %v4787_v40  ;;  %v4118_v40 = vpack.c.bf16 %v722_v34, %v722_v34  ;;  %v5536_v42 = vld [vmem:[#allocation2 + $0x10] sm:$0xf]  ;;  %v630_v46 = vadd.f32 %v5464_v24, %v605_v35  ;;  %820 = vst [vmem:[#allocation2 + $0x18] sm:$0xf] %v4117_v39  ;;  %v586_v23 = vunpack.c.l.bf16 %v568_v9  ;;  %v609_v33 = vmul.f32 %v5459_v21, %v584_v4  ;;  %v4794_v35 = vld [vmem:[#allocation6] sm:$0xff]  }
  0xc2   : > { %4175 = vmatprep.subr.bf16.mxu1 %v4788_v41  ;;  %v5534_v41 = vld [vmem:[#allocation2 + $0x8] sm:$0xf]  ;;  %v632_v50 = vadd.f32 %v5464_v24, %v607_v36  ;;  %824 = vst [vmem:[#allocation2 + $0x20] sm:$0xf] %v4119_v43  ;;  %v826_v53 = vsel %vm5503_vm10, %v4120_v44, %v825_v29  ;;  %v647_v54 = vmax.f32 %v629_v45, 0.0 }
  0xc3   : > { %v822_v47 = vsel %vm5503_vm10, %v4118_v40, %v821_v22  ;;  %v1005_v51 = vld [vmem:[#allocation2 + $0xc] sm:$0x1]  ;;  %v1006_v52 = vld [vmem:[#allocation2 + $0x14] sm:$0x1]  ;;  %v648_v56 = vmax.f32 %v630_v46, 0.0  ;;  %v585_v22 = vunpack.c.h.bf16 %v565_v61  ;;  %v3860_v34 = vcombine.low %v5534_v41, %v5536_v42 }
  0xc4   : > { %823 = vst [vmem:[#allocation2 + $0x1c] sm:$0x1] %v822_v47  ;;  %v3852_v57 = vcombine.low %v5534_v41, %v1005_v51  ;;  %v3853_v58 = vcombine.low %v5536_v42, %v1006_v52  ;;  %827 = vst [vmem:[#allocation2 + $0x24] sm:$0x1] %v826_v53  ;;  %v650_v60 = vmax.f32 %v632_v50, 0.0  ;;  %v725_v63 = vsel %vm5483_vm8, 0.0, %v647_v54 }
  0xc5   : > { %4176 = vmatpush3.bf16.msra.mxu1 %v4789_v48  ;;  %v631_v48 = vadd.f32 %v5464_v24, %v606_v32  ;;  %v726_v1 = vsel %vm5489_vm9, 0.0, %v648_v56  ;;  %v4121_v12 = vpack.c.bf16 %v725_v63, %v725_v63  ;;  %v610_v38 = vmul.f32 %v5459_v21, %v585_v22  ;;  %v5580_v41 = vld [vmem:[%s6083_s1] sm:$0x1]  ;;  %v4795_v42 = vld [vmem:[#allocation6 + $0x48] sm:$0xff]   ;;  %v837_v56 = vld [vmem:[#allocation2 + $0x3c] sm:$0x1] }
  0xc6   : > { %4201 = vmatprep.subr.bf16.mxu1 %v4793_v3  ;;  %v583_v3 = vunpack.c.l.bf16 %v565_v61  ;;  %v1054_v5 = vshrl.u32 %v3852_v57, 16  ;;  %v1056_v6 = vshll.u32 %v3852_v57, 16  ;;  %v1061_v7 = vshrl.u32 %v3853_v58, 16  ;;  %v551_v57 = vld [vmem:[%s5451_s26] sm:$0xf] }
  0xc7   : > { %v649_v59 = vmax.f32 %v631_v48, 0.0  ;;  %v1063_v8 = vshll.u32 %v3853_v58, 16  ;;  %v728_v11 = vsel %vm5489_vm9, 0.0, %v650_v60  ;;  %v4122_v13 = vpack.c.bf16 %v726_v1, %v726_v1  ;;  %828 = vst [vmem:[#allocation2 + $0x28] sm:$0xf] %v4121_v12  ;;  %v4796_v58 = vld [vmem:[#allocation6 + $0x8] sm:$0xff]  }
  0xc8   : > { %v1058_v15 = vrot.slane %v1056_v6, 1  ;;  %v4124_v18 = vpack.c.bf16 %v728_v11, %v728_v11  ;;  %v5559_v19 = vld [vmem:[#allocation2 + $0x18] sm:$0xf]  ;;  %v608_v26 = vmul.f32 %v5459_v21, %v583_v3  ;;  %v611_v39 = vmul.f32 %v5459_v21, %v586_v23  ;;  %v4800_v6 = vld [vmem:[#allocation6 + $0x50] sm:$0xff]  }
  0xc9   : > { %v727_v10 = vsel %vm5483_vm8, 0.0, %v649_v59  ;;  %v1065_v16 = vrot.slane %v1063_v8, 1  ;;  %v830_v20 = vsel %vm5503_vm10, %v4122_v13, %v829_v2  ;;  %v5564_v29 = vld [vmem:[#allocation2 + $0x20] sm:$0xf]  ;;  %v634_v45 = vadd.f32 %v5464_v24, %v609_v33  ;;  %v4802_v33 = vld [vmem:[#allocation6 + $0x58] sm:$0xff]  }
  0xca   : > { %v4123_v17 = vpack.c.bf16 %v727_v10, %v727_v10  ;;  %v1059_v27 = vor.u32 %v1058_v15, %v1054_v5  ;;  %831 = vst [vmem:[#allocation2 + $0x2c] sm:$0x1] %v830_v20  ;;  %v834_v32 = vsel %vm5503_vm10, %v4124_v18, %v833_v14  ;;  %v633_v44 = vadd.f32 %v5464_v24, %v608_v26 }
  0xcb   : > { %v1066_v28 = vor.u32 %v1065_v16, %v1061_v7  ;;  %v1007_v30 = vld [vmem:[#allocation2 + $0x1c] sm:$0x1]  ;;  %v1008_v36 = vld [vmem:[#allocation2 + $0x24] sm:$0x1]  ;;  %835 = vst [vmem:[#allocation2 + $0x34] sm:$0x1] %v834_v32  ;;  %v635_v48 = vadd.f32 %v5464_v24, %v610_v38  ;;  %v636_v50 = vadd.f32 %v5464_v24, %v611_v39  ;;  %v3862_v60 = vcombine.low %v5559_v19, %v5564_v29 }
  0xcc   : > { %832 = vst [vmem:[#allocation2 + $0x30] sm:$0xf] %v4123_v17  ;;  %v3854_v37 = vcombine.low %v5559_v19, %v1007_v30  ;;  %v3855_v43 = vcombine.low %v5564_v29, %v1008_v36  ;;  %v651_v53 = vmax.f32 %v633_v44, 0.0  ;;  %v652_v54 = vmax.f32 %v634_v45, 0.0  ;;  %v4801_v17 = vld [vmem:[#allocation6 + $0x10] sm:$0xff]  }
  0xcd   : > { %v3861_v40 = vcombine.low %v1059_v27, %v1066_v28  ;;  %v653_v61 = vmax.f32 %v635_v48, 0.0  ;;  %vm669_vm11 = vcmp.eq.s32.totalorder %v5580_v41, 2  ;;  %v654_v15 = vmax.f32 %v636_v50, 0.0  ;;  %v841_v28 = vld [vmem:[#allocation2 + $0x44] sm:$0x1] }
  0xce   : > { %v1068_v46 = vshrl.u32 %v3854_v37, 16  ;;  %v1070_v47 = vshll.u32 %v3854_v37, 16  ;;  %v1075_v51 = vshrl.u32 %v3855_v43, 16  ;;  %v1077_v52 = vshll.u32 %v3855_v43, 16  ;;  %v5589_v1 = vld [vmem:[#allocation2 + $0x28] sm:$0xf] }
  0xcf   : > { %1294 = vmatprep.mubr.bf16.mxu1 %v3861_v40  ;;  %v670_v2 = vsel %vm669_vm11, 1, %v5174_v31  ;;  %v729_v3 = vsel %vm5483_vm8, 0.0, %v651_v53  ;;  %v730_v4 = vsel %vm5489_vm9, 0.0, %v652_v54  ;;  %v569_v16 = vunpack.c.l.bf16 %v551_v57  ;;  %v5612_v30 = vld [vmem:[#allocation2 + $0x8] sm:$0xf]  ;;  %v4807_v57 = vld [vmem:[#allocation6 + $0x60] sm:$0xff]  }
  0xd0   : > { %1295 = vmatmul.mubr.bf16.vlgmr.msra.gmra.mrb[0].mxu1 %v3860_v34  ;;  %v1072_v59 = vrot.slane %v1070_v47, 1  ;;  %v1079_v63 = vrot.slane %v1077_v52, 1  ;;  %v674_v9 = vrot.slane %v670_v2, %v5466_v25  ;;  %v4125_v10 = vpack.c.bf16 %v729_v3, %v729_v3  ;;  %v853_v32 = vld [vmem:[#allocation2 + $0xc] sm:$0x1]  ;;  %v5619_v38 = vld [vmem:[#allocation2 + $0x10] sm:$0xf] }
  0xd1   : > { %4202 = vmatpush3.bf16.msra.mxu1 %v4794_v35  ;;  %v1009_v8 = vld [vmem:[#allocation2 + $0x2c] sm:$0x1]  ;;  %v4126_v11 = vpack.c.bf16 %v730_v4, %v730_v4  ;;  %v570_v22 = vunpack.c.l.bf16 %v552_v62  ;;  %v594_v29 = vmul.f32 %v5459_v21, %v569_v16  ;;  %v5622_v45 = vld [vmem:[#allocation2 + $0x18] sm:$0xf]  ;;  %vm660_vm15 = vcmp.eq.s32.totalorder %v5580_v41, 1 }
  0xd2   : > { %4203 = vmatprep.subr.bf16.mxu1 %v4795_v42  ;;  %v1073_v5 = vor.u32 %v1072_v59, %v1068_v46  ;;  %v1080_v12 = vor.u32 %v1079_v63, %v1075_v51  ;;  %v1010_v13 = vld [vmem:[#allocation2 + $0x34] sm:$0x1]  ;;  %v3856_v14 = vcombine.low %v5589_v1, %v1009_v8  ;;  %vm5601_vm12 = vcmp.eq.s32.totalorder %v674_v9, 1  ;;  %836 = vst [vmem:[#allocation2 + $0x38] sm:$0xf] %v4125_v10  ;;  %v4809_v10 = vld [vmem:[#allocation6 + $0x68] sm:$0xff]  }
  0xd3   : > { %v5596_v7 = vld [vmem:[#allocation2 + $0x30] sm:$0xf]  ;;  %v838_v20 = vsel %vm5503_vm10, %v4126_v11, %v837_v56  ;;  %vm696_vm13 = vmor %vm5601_vm12, %vm5483_vm8  ;;  %v595_v37 = vmul.f32 %v5459_v21, %v570_v22  ;;  %v619_v44 = vadd.f32 %v5464_v24, %v594_v29  ;;  %v854_v42 = vld [vmem:[#allocation2 + $0x14] sm:$0x1]  ;;  %v661_v52 = vsel %vm660_vm15, 1, %v5174_v31 }
  0xd4   : > { %v3857_v18 = vcombine.low %v5596_v7, %v1010_v13  ;;  %v3863_v23 = vcombine.low %v1073_v5, %v1080_v12  ;;  %v1082_v26 = vshrl.u32 %v3856_v14, 16  ;;  %v1084_v27 = vshll.u32 %v3856_v14, 16  ;;  %839 = vst [vmem:[#allocation2 + $0x3c] sm:$0x1] %v838_v20  ;;  %vm714_vm14 = vmor %vm5601_vm12, %vm5489_vm9  ;;  %v855_v50 = vld [vmem:[#allocation2 + $0x1c] sm:$0x1] }
  0xd5   : > { %4204 = vmatpush3.bf16.msra.mxu1 %v4796_v58  ;;  %v731_v36 = vsel %vm696_vm13, 0.0, %v653_v61  ;;  %v732_v40 = vsel %vm714_vm14, 0.0, %v654_v15  ;;  %v620_v48 = vadd.f32 %v5464_v24, %v595_v37  ;;  %v4803_v21 = vld [vmem:[#allocation6 + $0x18] sm:$0xff]   ;;  %v5628_v53 = vcombine.low %v5612_v30, %v853_v32  ;;  %v5630_v54 = vld [vmem:[#allocation2 + $0x20] sm:$0xf] }
  0xd6   : > { %4205 = vmatprep.subr.bf16.mxu1 %v4800_v6  ;;  %v1089_v34 = vshrl.u32 %v3857_v18, 16  ;;  %v1091_v35 = vshll.u32 %v3857_v18, 16  ;;  %1302 = vmatprep.mubr.bf16.mxu1 %v3863_v23  ;;  %v1086_v39 = vrot.slane %v1084_v27, 1  ;;  %v4127_v43 = vpack.c.bf16 %v731_v36, %v731_v36  ;;  %v5635_v59 = vld [vmem:[#allocation2 + $0x28] sm:$0xf] }
  0xd7   : > { %v4128_v47 = vpack.c.bf16 %v732_v40, %v732_v40  ;;  %v637_v58 = vmax.f32 %v619_v44, 0.0  ;;  %v665_v41 = vrot.slane %v661_v52, %v5466_v25  ;;  %v638_v31 = vmax.f32 %v620_v48, 0.0  ;;  %v856_v2 = vld [vmem:[#allocation2 + $0x24] sm:$0x1]  ;;  %v857_v9 = vld [vmem:[#allocation2 + $0x2c] sm:$0x1] }
  0xd8   : > { %1303 = vmatmul.mubr.bf16.gmra.mrb[4].mxu1 %v3862_v60  ;;  %v1093_v46 = vrot.slane %v1091_v35, 1  ;;  %v1087_v51 = vor.u32 %v1086_v39, %v1082_v26  ;;  %840 = vst [vmem:[#allocation2 + $0x40] sm:$0xf] %v4127_v43  ;;  %v4808_v60 = vld [vmem:[#allocation6 + $0x20] sm:$0xff]   ;;  %v5640_v62 = vcombine.low %v5619_v38, %v854_v42  ;;  %v5643_v63 = vcombine.low %v5622_v45, %v855_v50  ;;  %v5669_v19 = vld [vmem:[#allocation2 + $0x30] sm:$0xf] }
  0xd9   : > { %4206 = vmatpush3.bf16.msra.mxu1 %v4801_v17  ;;  %v842_v24 = vsel %vm5503_vm10, %v4128_v47, %v841_v28  ;;  %v5637_v61 = vld [vmem:[#allocation2 + $0x38] sm:$0xf]  ;;  %v3864_v4 = vcombine.low %v5589_v1, %v5596_v7  ;;  %vm5647_vm1 = vcmp.eq.s32.totalorder %v665_v41, 1  ;;  %v910_v8 = vshll.u32 %v5628_v53, 16  ;;  %v809_v7 = vld [vmem:[#allocation2 + $0x4] sm:$0x1] }
  0xda   : > { %4207 = vmatprep.subr.bf16.mxu1 %v4802_v33  ;;  %v1094_v56 = vor.u32 %v1093_v46, %v1089_v34  ;;  %843 = vst [vmem:[#allocation2 + $0x44] sm:$0x1] %v842_v24  ;;  %vm692_vm2 = vmor %vm5647_vm1, %vm5483_vm8  ;;  %v917_v12 = vshll.u32 %v5640_v62, 16  ;;  %v924_v13 = vshll.u32 %v5643_v63, 16  ;;  %v5664_v14 = vcombine.low %v5630_v54, %v856_v2  ;;  %v5671_v55 = vld [vmem:[#allocation2 + $0x38] sm:$0xf] }
  0xdb   : > { %v1011_v5 = vld [vmem:[#allocation2 + $0x3c] sm:$0x1]  ;;  %vm710_vm3 = vmor %vm5647_vm1, %vm5489_vm9  ;;  %v715_v1 = vsel %vm692_vm2, 0.0, %v637_v58  ;;  %v5667_v18 = vcombine.low %v5635_v59, %v857_v9  ;;  %v858_v20 = vld [vmem:[#allocation2 + $0x34] sm:$0x1]  ;;  %v908_v28 = vshrl.u32 %v5628_v53, 16 }
  0xdc   : > { %v3865_v3 = vcombine.low %v1087_v51, %v1094_v56  ;;  %v3858_v11 = vcombine.low %v5637_v61, %v1011_v5  ;;  %v716_v16 = vsel %vm710_vm3, 0.0, %v638_v31  ;;  %v4111_v17 = vpack.c.bf16 %v715_v1, %v715_v1  ;;  %v859_v22 = vld [vmem:[#allocation2 + $0x3c] sm:$0x1]  ;;  %v4814_v26 = vld [vmem:[#allocation6 + $0x70] sm:$0xff]   ;;  %v4816_v47 = vld [vmem:[#allocation6 + $0x78] sm:$0xff]  }
  0xdd   : > { %4208 = vmatpush3.bf16.msra.mxu1 %v4803_v21  ;;  %v4112_v27 = vpack.c.bf16 %v716_v16, %v716_v16  ;;  %v912_v29 = vrot.slane %v910_v8, 1  ;;  %v915_v33 = vshrl.u32 %v5640_v62, 16  ;;  %v919_v34 = vrot.slane %v917_v12, 1  ;;  %v4815_v42 = vld [vmem:[#allocation6 + $0x30] sm:$0xff]  }
  0xde   : > { %1310 = vmatprep.mubr.bf16.mxu1 %v3865_v3  ;;  %4209 = vmatprep.subr.bf16.mxu1 %v4807_v57  ;;  %v1098_v15 = vshll.u32 %v3858_v11, 16  ;;  %v1096_v32 = vshrl.u32 %v3858_v11, 16  ;;  %805 = vst [vmem:[#allocation2] sm:$0xf] %v4111_v17  ;;  %v922_v35 = vshrl.u32 %v5643_v63, 16  ;;  %v926_v39 = vrot.slane %v924_v13, 1 }
  0xdf   : > { %v1004_v23 = vld [vmem:[#allocation2 + $0x40] sm:$0xf]  ;;  %v810_v37 = vsel %vm5503_vm10, %v4112_v27, %v809_v7  ;;  %v931_v40 = vshll.u32 %v5664_v14, 16  ;;  %v938_v46 = vshll.u32 %v5667_v18, 16  ;;  %v3850_v48 = vcombine.low %v5669_v19, %v858_v20 }
  0xe0   : > { %1311 = vmatmul.mubr.bf16.gmra.mrb[8].mxu1 %v3864_v4  ;;  %v1100_v44 = vrot.slane %v1098_v15, 1  ;;  %811 = vst [vmem:[#allocation2 + $0x4] sm:$0x1] %v810_v37  ;;  %v3851_v50 = vcombine.low %v5671_v55, %v859_v22  ;;  %v929_v0 = vshrl.u32 %v5664_v14, 16  ;;  %v936_v52 = vshrl.u32 %v5667_v18, 16  ;;  %v4843_v37 = vld [vmem:[#allocation12 + $0xe0] sm:$0xff]  }
  0xe1   : > { %4210 = vmatpush3.bf16.msra.mxu1 %v4808_v60  ;;  %v1012_v36 = vld [vmem:[#allocation2 + $0x44] sm:$0x1]  ;;  %v933_v53 = vrot.slane %v931_v40, 1  ;;  %v940_v56 = vrot.slane %v938_v46, 1  ;;  %v943_v57 = vshrl.u32 %v3850_v48, 16  ;;  %v945_v24 = vshll.u32 %v3850_v48, 16 }
  0xe2   : > { %4211 = vmatprep.subr.bf16.mxu1 %v4809_v10  ;;  %v3859_v43 = vcombine.low %v1004_v23, %v1012_v36  ;;  %v1101_v58 = vor.u32 %v1100_v44, %v1096_v32  ;;  %v4817_v60 = vld [vmem:[#allocation6 + $0x38] sm:$0xff]   ;;  %v950_v31 = vshrl.u32 %v3851_v50, 16  ;;  %v952_v2 = vshll.u32 %v3851_v50, 16  ;;  %v4842_v36 = vld [vmem:[#allocation12 + $0x120] sm:$0xff]   ;;  %v4846_v46 = vld [vmem:[#allocation12 + $0xe8] sm:$0xff]  }
  0xe3   : > { %v947_v63 = vrot.slane %v945_v24, 1  ;;  %v3866_v4 = vcombine.low %v5637_v61, %v1004_v23  ;;  %v913_v11 = vor.u32 %v912_v29, %v908_v28  ;;  %v920_v1 = vor.u32 %v919_v34, %v915_v33  ;;  %v4832_v28 = vld [vmem:[#allocation12 + $0x140] sm:$0xff]   ;;  %v4833_v29 = vld [vmem:[#allocation12 + $0x108] sm:$0xff]   ;;  %v4836_v32 = vld [vmem:[#allocation12 + $0x110] sm:$0xff]  }
  0xe4   : > { %v1103_v21 = vshrl.u32 %v3859_v43, 16  ;;  %v1105_v51 = vshll.u32 %v3859_v43, 16  ;;  %v927_v7 = vor.u32 %v926_v39, %v922_v35  ;;  %v954_v13 = vrot.slane %v952_v2, 1  ;;  %v4837_v33 = vld [vmem:[#allocation12 + $0xd0] sm:$0xff]   ;;  %v4840_v34 = vld [vmem:[#allocation12 + $0xd8] sm:$0xff]   ;;  %v4844_v44 = vld [vmem:[#allocation12 + $0x160] sm:$0xff]  }
  0xe5   : > { %4212 = vmatpush3.bf16.msra.mxu1 %v4810_v49  ;;  %v844_v62 = vld [vmem:[#allocation2] sm:$0xf]  ;;  %v934_v16 = vor.u32 %v933_v53, %v929_v0  ;;  %v941_v17 = vor.u32 %v940_v56, %v936_v52  ;;  %v5691_v18 = vcombine.low %v5619_v38, %v5622_v45  ;;  %v948_v22 = vor.u32 %v947_v63, %v943_v57  ;;  %v4841_v35 = vld [vmem:[#allocation12 + $0x158] sm:$0xff]   ;;  %v4848_v48 = vld [vmem:[#allocation12 + $0x130] sm:$0xff]  }
  0xe6   : > { %4213 = vmatprep.subr.bf16.mxu1 %v4814_v26  ;;  %v1107_v41 = vrot.slane %v1105_v51, 1  ;;  %v5686_v49 = vcombine.low %v844_v62, %v5612_v30  ;;  %v3887_v61 = vcombine.low %v920_v1, %v927_v7  ;;  %v955_v23 = vor.u32 %v954_v13, %v950_v31  ;;  %v4830_v38 = vld [vmem:[#allocation12 + $0x100] sm:$0xff]   ;;  %v4849_v50 = vld [vmem:[#allocation12 + $0xf0] sm:$0xff]   ;;  %v4853_v51 = vld [vmem:[#allocation12 + $0x138] sm:$0xff]  }
  0xe7   : > { %v852_v5 = vld [vmem:[#allocation2 + $0x4] sm:$0x1]  ;;  %v3889_v20 = vcombine.low %v934_v16, %v941_v17  ;;  %v5696_v30 = vcombine.low %v5630_v54, %v5635_v59  ;;  %v5701_v27 = vcombine.low %v5669_v19, %v5671_v55  ;;  %4241 = vmatprep.subr.bf16.mxu0 %v4830_v38  ;;  %v4834_v54 = vld [vmem:[#allocation12 + $0xc8] sm:$0xff]   ;;  %v4838_v19 = vld [vmem:[#allocation12 + $0x150] sm:$0xff]   ;;  %v5175_v39 = vmov 0.0|0.0  }
  0xe8   : > { %v1108_v3 = vor.u32 %v1107_v41, %v1103_v21  ;;  %v3844_v8 = vcombine.low %v844_v62, %v852_v5  ;;  %v3891_v26 = vcombine.low %v948_v22, %v955_v23  ;;  %v4831_v45 = vld [vmem:[#allocation12 + $0xc0] sm:$0xff]   ;;  %v4835_v59 = vld [vmem:[#allocation12 + $0x148] sm:$0xff]   ;;  %v4839_v55 = vld [vmem:[#allocation12 + $0x118] sm:$0xff]   ;;  %v3910_v40 = vcombine.low %v5175_v39, %v5175_v39 }
  0xe9   : > { %4214 = vmatpush3.bf16.msra.mxu1 %v4815_v42  ;;  %4242 = vmatpush3.bf16.msra.mxu0 %v4831_v45  ;;  %v3911_v43 = vcombine.high %v5175_v39, %v5175_v39  ;;  %v4845_v42 = vld [vmem:[#allocation12 + $0x128] sm:$0xff]   ;;  %v4850_v21 = vld [vmem:[#allocation12 + $0x170] sm:$0xff]   ;;  %v4854_v0 = vld [vmem:[#allocation12 + $0xf8] sm:$0xff]  }
  0xea   : > { %4215 = vmatprep.subr.bf16.mxu1 %v4816_v47  ;;  %v3867_v6 = vcombine.low %v1101_v58, %v1108_v3  ;;  %v901_v9 = vshrl.u32 %v3844_v8, 16  ;;  %v903_v10 = vshll.u32 %v3844_v8, 16  ;;  %4243 = vmatprep.subr.bf16.mxu0 %v4833_v29  ;;  %1671 = vst [vmem:[#allocation3] sm:$0xf] %v3910_v40  ;;  %1689 = vst [vmem:[#allocation3 + $0x48] sm:$0xf] %v3910_v40 }
  0xeb   : > { %1672 = vst [vmem:[#allocation3 + $0x4] sm:$0x1] %v3911_v43  ;;  %1690 = vst [vmem:[#allocation3 + $0x4c] sm:$0x1] %v3911_v43  ;;  %v4847_v47 = vld [vmem:[#allocation12 + $0x168] sm:$0xff]   ;;  %v4855_v52 = vld [vmem:[#allocation12 + $0x178] sm:$0xff]  }
  0xec   : > { %1318 = vmatprep.mubr.bf16.mxu1 %v3867_v6  ;;  %v905_v12 = vrot.slane %v903_v10, 1  ;;  %v4859_v53 = vld [vmem:[#allocation12 + $0x40] sm:$0xff]   ;;  %3670 = vst [vmem:[%s5715_s19] sm:$0xf] %v3910_v40  ;;  %3671 = vst [vmem:[%s5715_s19 + $0x4] sm:$0x1] %v3911_v43 }
  0xed   : > { %4216 = vmatpush3.bf16.msra.mxu1 %v4817_v60  ;;  %4244 = vmatpush3.bf16.msra.mxu0 %v4834_v54  ;;  %v5708_v56 = vld [vmem:[#allocation12 + $0x80] sm:$0xff]   ;;  %3688 = vst [vmem:[%s5715_s19 + $0x48] sm:$0xf] %v3910_v40  ;;  %3689 = vst [vmem:[%s5715_s19 + $0x4c] sm:$0x1] %v3911_v43 }
  0xee   : > { %1319 = vmatmul.mubr.bf16.gmra.mrb[12].mxu1 %v3866_v4  ;;  %v906_v14 = vor.u32 %v905_v12, %v901_v9  ;;  %4443 = vmatprep.subr.bf16.mxu1 %v4832_v28  ;;  %v5725_v23 = vld [vmem:[#allocation9] ss:$0 sm:$0xff] }
  0xef   : > { %4245 = vmatprep.subr.bf16.mxu0 %v4836_v32 }
  0xf0   : > { %v3885_v15 = vcombine.low %v906_v14, %v913_v11 }
  0xf1   : > { %4246 = vmatpush3.bf16.msra.mxu0 %v4837_v33 }
  0xf2   : > { %1471 = vmatprep.mubr.bf16.mxu1 %v3885_v15  ;;  %4247 = vmatprep.subr.bf16.mxu0 %v4839_v55 }
  0xf5   : > { %4248 = vmatpush3.bf16.msra.mxu0 %v4840_v34 }
  0xf6   : > { %1472 = vmatmul.mubr.bf16.vlgmr.msra.gmra.mrb[16].mxu1 %v5686_v49  ;;  %4249 = vmatprep.subr.bf16.mxu0 %v4842_v36 }
  0xf7   : > { %1479 = vmatprep.mubr.bf16.mxu1 %v3887_v61  ;;  %4444 = vmatpush3.bf16.msra.mxu1 %v4832_v28  ;;  %v5727_v28 = vld [vmem:[#allocation11] ss:$0 sm:$0xff] }
  0xf8   : > { %4445 = vmatprep.subr.bf16.mxu1 %v4835_v59 }
  0xf9   : > { %4250 = vmatpush3.bf16.msra.mxu0 %v4843_v37 }
  0xfa   : > { %4251 = vmatprep.subr.bf16.mxu0 %v4845_v42 }
  0xfb   : > { %4446 = vmatpush3.bf16.msra.mxu1 %v4835_v59 }
  0xfc   : > { %4447 = vmatprep.subr.bf16.mxu1 %v4838_v19 }
  0xfd   : > { %4252 = vmatpush3.bf16.msra.mxu0 %v4846_v46 }
  0xfe   : > { %1480 = vmatmul.mubr.bf16.gmra.mrb[20].mxu1 %v5691_v18  ;;  %4253 = vmatprep.subr.bf16.mxu0 %v4848_v48 }
  0xff   : > { %1487 = vmatprep.mubr.bf16.mxu1 %v3889_v20  ;;  %4448 = vmatpush3.bf16.msra.mxu1 %v4838_v19 }
 0x100   : > { %4449 = vmatprep.subr.bf16.mxu1 %v4841_v35 }
 0x101   : > { %4254 = vmatpush3.bf16.msra.mxu0 %v4849_v50 }
 0x102   : > { %4255 = vmatprep.subr.bf16.mxu0 %v4853_v51 }
 0x103   : > { %4450 = vmatpush3.bf16.msra.mxu1 %v4841_v35 }
 0x104   : > { %4451 = vmatprep.subr.bf16.mxu1 %v4844_v44 }
 0x105   : > { %4256 = vmatpush3.bf16.msra.mxu0 %v4854_v0 }
 0x106   : > { %1488 = vmatmul.mubr.bf16.gmra.mrb[24].mxu1 %v5696_v30  ;;  %4293 = vmatprep.subr.bf16.mxu0 %v4859_v53 }
 0x107   : > { %1495 = vmatprep.mubr.bf16.mxu1 %v3891_v26  ;;  %4452 = vmatpush3.bf16.msra.mxu1 %v4844_v44 }
 0x108   : > { %4453 = vmatprep.subr.bf16.mxu1 %v4847_v47 }
 0x10b   : > { %4454 = vmatpush3.bf16.msra.mxu1 %v4847_v47 }
 0x10c   : > { %4455 = vmatprep.subr.bf16.mxu1 %v4850_v21 }
 0x10e   : > { %1496 = vmatmul.mubr.bf16.gmra.mrb[28].mxu1 %v5701_v27 }
 0x10f   : > { %4456 = vmatpush3.bf16.msra.mxu1 %v4850_v21 }
 0x110   : > { %4457 = vmatprep.subr.bf16.mxu1 %v4855_v52 }
 0x113   : > { %4458 = vmatpush3.bf16.msra.mxu1 %v4855_v52 }
 0x114   : > { %4467 = vmatprep.subr.bf16.mxu1 %v5708_v56 }
 0x1a3   : > { %v4177_v57 = vpop.f32.mrb[0].mxu1 }
 0x1a4   : > { %v4178_v24 = vpop.f32.mrb[1].mxu1 }
 0x1a5   : > { %v4179_v58 = vadd.f32 %v4178_v24, %v4177_v57  ;;  %v4180_v41 = vpop.f32.mrb[2].mxu1 }
 0x1a6   : > { %v4181_v60 = vpop.f32.mrb[3].mxu1 }
 0x1a7   : > { %v4182_v31 = vadd.f32 %v4181_v60, %v4180_v41 }
 0x1ab   : > { %v4183_v62 = vpop.f32.mrb[4].mxu1 }
 0x1ac   : > { %v4184_v63 = vpop.f32.mrb[5].mxu1 }
 0x1ad   : > { %v4185_v2 = vadd.f32 %v4184_v63, %v4183_v62  ;;  %v4186_v3 = vpop.f32.mrb[6].mxu1 }
 0x1ae   : > { %v4187_v4 = vpop.f32.mrb[7].mxu1 }
 0x1af   : > { %v4188_v5 = vadd.f32 %v4187_v4, %v4186_v3 }
 0x1b3   : > { %v4189_v6 = vpop.f32.mrb[8].mxu1 }
 0x1b4   : > { %v4190_v8 = vpop.f32.mrb[9].mxu1 }
 0x1b5   : > { %v4191_v9 = vadd.f32 %v4190_v8, %v4189_v6  ;;  %v4192_v10 = vpop.f32.mrb[10].mxu1 }
 0x1b6   : > { %v4193_v11 = vpop.f32.mrb[11].mxu1 }
 0x1b7   : > { %v4194_v12 = vadd.f32 %v4193_v11, %v4192_v10 }
 0x1c1   : > { %v4195_v1 = vpop.f32.mrb[12].mxu1 }
 0x1c2   : > { %v4196_v7 = vpop.f32.mrb[13].mxu1 }
 0x1c3   : > { %v5721_v13 = vadd.f32 %v4196_v7, %v4195_v1  ;;  %v4198_v14 = vpop.f32.mrb[14].mxu1 }
 0x1c4   : > { %v4199_v15 = vpop.f32.mrb[15].mxu1 }
 0x1c5   : > { %v5723_v61 = vadd.f32 %v4199_v15, %v4198_v14 }
 0x1c9   : > { %v4217_v16 = vpop.f32.mrb[16].mxu1 }
 0x1ca   : > { %v4218_v17 = vpop.f32.mrb[17].mxu1 }
 0x1cb   : > { %v4219_v20 = vadd.f32 %v4218_v17, %v4217_v16  ;;  %v4220_v22 = vpop.f32.mrb[18].mxu1 }
 0x1cc   : > { %v4221_v26 = vpop.f32.mrb[19].mxu1 }
 0x1cd   : > { %v1474_v38 = vadd.f32 %v4219_v20, %v4179_v58  ;;  %v4222_v45 = vadd.f32 %v4221_v26, %v4220_v22 }
 0x1cf   : > { %v1527_v29 = vmul.f32 %v5725_v23, %v1474_v38  ;;  %v1477_v54 = vadd.f32 %v4222_v45, %v4182_v31 }
 0x1d1   : > { %v1542_v59 = vadd.f32 %v5727_v28, %v1527_v29  ;;  %v1528_v32 = vmul.f32 %v5725_v23, %v1477_v54  ;;  %v4223_v33 = vpop.f32.mrb[20].mxu1 }
 0x1d2   : > { %v4224_v19 = vpop.f32.mrb[21].mxu1 }
 0x1d3   : > { %v1550_v55 = vmax.f32 %v1542_v59, 0.0  ;;  %v1543_v34 = vadd.f32 %v5727_v28, %v1528_v32  ;;  %v4225_v35 = vadd.f32 %v4224_v19, %v4223_v33  ;;  %v4226_v36 = vpop.f32.mrb[22].mxu1 }
 0x1d4   : > { %v4227_v37 = vpop.f32.mrb[23].mxu1 }
 0x1d5   : > { %v1566_v40 = vrot.slane %v1550_v55, 7  ;;  %v1551_v43 = vmax.f32 %v1543_v34, 0.0  ;;  %v1482_v44 = vadd.f32 %v4225_v35, %v4185_v2  ;;  %v4228_v42 = vadd.f32 %v4227_v37, %v4226_v36 }
 0x1d7   : > { %v1583_v46 = vsel %vm806_vm0, 0.0, %v1566_v40  ;;  %v1591_v47 = vsel %vm806_vm0, %v1566_v40, 0.0  ;;  %v1567_v48 = vrot.slane %v1551_v43, 7  ;;  %v1529_v50 = vmul.f32 %v5725_v23, %v1482_v44 }
 0x1d8   : > { %v4129_v21 = vpack.c.bf16 %v1583_v46, %v1583_v46  ;;  %v4130_v51 = vpack.c.bf16 %v1591_v47, %v1591_v47  ;;  %v1485_v0 = vadd.f32 %v4228_v42, %v4188_v5 }
 0x1d9   : > { %v1584_v52 = vsel %vm806_vm0, 0.0, %v1567_v48  ;;  %v1592_v53 = vsel %vm806_vm0, %v1567_v48, 0.0  ;;  %v1544_v57 = vadd.f32 %v5727_v28, %v1529_v50  ;;  %v4229_v24 = vpop.f32.mrb[24].mxu1 }
 0x1da   : > { %1673 = vst [vmem:[#allocation3 + $0x8] sm:$0xf] %v4129_v21  ;;  %1674 = vst [vmem:[#allocation3 + $0xc] sm:$0x1] %v4130_v51  ;;  %v4131_v58 = vpack.c.bf16 %v1584_v52, %v1584_v52  ;;  %v4132_v41 = vpack.c.bf16 %v1592_v53, %v1592_v53  ;;  %v1530_v60 = vmul.f32 %v5725_v23, %v1485_v0  ;;  %v4230_v31 = vpop.f32.mrb[25].mxu1 }
 0x1db   : > { %v1552_v62 = vmax.f32 %v1544_v57, 0.0  ;;  %v4231_v63 = vadd.f32 %v4230_v31, %v4229_v24  ;;  %v4232_v2 = vpop.f32.mrb[26].mxu1 }
 0x1dc   : > { %1675 = vst [vmem:[#allocation3 + $0x10] sm:$0xf] %v4131_v58  ;;  %1676 = vst [vmem:[#allocation3 + $0x14] sm:$0x1] %v4132_v41  ;;  %v1545_v3 = vadd.f32 %v5727_v28, %v1530_v60  ;;  %v4233_v4 = vpop.f32.mrb[27].mxu1 }
 0x1dd   : > { %v1568_v5 = vrot.slane %v1552_v62, 7  ;;  %v1490_v6 = vadd.f32 %v4231_v63, %v4191_v9  ;;  %v4234_v8 = vadd.f32 %v4233_v4, %v4232_v2 }
 0x1de   : > { %v1553_v10 = vmax.f32 %v1545_v3, 0.0 }
 0x1df   : > { %v1585_v11 = vsel %vm806_vm0, 0.0, %v1568_v5  ;;  %v1593_v1 = vsel %vm806_vm0, %v1568_v5, 0.0  ;;  %v1531_v7 = vmul.f32 %v5725_v23, %v1490_v6  ;;  %v1493_v14 = vadd.f32 %v4234_v8, %v4194_v12 }
 0x1e0   : > { %v4133_v15 = vpack.c.bf16 %v1585_v11, %v1585_v11  ;;  %v4134_v16 = vpack.c.bf16 %v1593_v1, %v1593_v1  ;;  %v1569_v17 = vrot.slane %v1553_v10, 7 }
 0x1e1   : > { %v1546_v20 = vadd.f32 %v5727_v28, %v1531_v7  ;;  %v1532_v22 = vmul.f32 %v5725_v23, %v1493_v14  ;;  %v4235_v26 = vpop.f32.mrb[28].mxu1  ;;  %v1916_v38 = vld [vmem:[#allocation3 + $0xc] sm:$0x1]  ;;  %v1924_v45 = vld [vmem:[#allocation3 + $0x8] sm:$0xe] }
 0x1e2   : > { %1677 = vst [vmem:[#allocation3 + $0x18] sm:$0xf] %v4133_v15  ;;  %1678 = vst [vmem:[#allocation3 + $0x1c] sm:$0x1] %v4134_v16  ;;  %v1586_v9 = vsel %vm806_vm0, 0.0, %v1569_v17  ;;  %v1594_v29 = vsel %vm806_vm0, %v1569_v17, 0.0  ;;  %v3952_v59 = vcombine.low %v1924_v45, %v1916_v38 }
 0x1e3   : > { %v4236_v54 = vpop.f32.mrb[29].mxu1  ;;  %v5748_v32 = vld [vmem:[#allocation3 + $0x8] sm:$0xf]  ;;  %v4135_v12 = vpack.c.bf16 %v1586_v9, %v1586_v9  ;;  %v4136_v33 = vpack.c.bf16 %v1594_v29, %v1594_v29  ;;  %v1554_v19 = vmax.f32 %v1546_v20, 0.0  ;;  %v1547_v55 = vadd.f32 %v5727_v28, %v1532_v22  ;;  %v1917_v35 = vld [vmem:[#allocation3 + $0x14] sm:$0x1] }
 0x1e4   : > { %v4238_v34 = vpop.f32.mrb[30].mxu1  ;;  %v1925_v36 = vld [vmem:[#allocation3 + $0x10] sm:$0xe]  ;;  %v4237_v37 = vadd.f32 %v4236_v54, %v4235_v26  ;;  %v3944_v42 = vcombine.low %v5748_v32, %v1916_v38  ;;  %v2052_v50 = vrot.slane %v3952_v59, 1 }
 0x1e5   : > { %v4239_v40 = vpop.f32.mrb[31].mxu1  ;;  %v3953_v43 = vcombine.low %v1925_v36, %v1917_v35  ;;  %v5751_v44 = vld [vmem:[#allocation3 + $0x10] sm:$0xf]  ;;  %1679 = vst [vmem:[#allocation3 + $0x20] sm:$0xf] %v4135_v12  ;;  %v1570_v46 = vrot.slane %v1554_v19, 7 }
 0x1e6   : > { %1680 = vst [vmem:[#allocation3 + $0x24] sm:$0x1] %v4136_v33  ;;  %v1555_v47 = vmax.f32 %v1547_v55, 0.0  ;;  %v4240_v48 = vadd.f32 %v4239_v40, %v4238_v34  ;;  %v1498_v21 = vadd.f32 %v4237_v37, %v5721_v13  ;;  %v3945_v0 = vcombine.low %v5751_v44, %v1917_v35  ;;  %v4860_v36 = vld [vmem:[#allocation12] sm:$0xff]  }
 0x1e7   : > { %v2053_v51 = vrot.slane %v3953_v43, 1  ;;  %v1975_v52 = vshll.u32 %v3944_v42, 16  ;;  %v1587_v53 = vsel %vm806_vm0, 0.0, %v1570_v46  ;;  %v1595_v57 = vsel %vm806_vm0, %v1570_v46, 0.0 }
 0x1e8   : > { %v1571_v24 = vrot.slane %v1555_v47, 7  ;;  %v1501_v58 = vadd.f32 %v4240_v48, %v5723_v61  ;;  %v4137_v41 = vpack.c.bf16 %v1587_v53, %v1587_v53  ;;  %v4138_v60 = vpack.c.bf16 %v1595_v57, %v1595_v57  ;;  %v4864_v53 = vld [vmem:[#allocation12 + $0x48] sm:$0xff]  }
 0x1e9   : > { %v1533_v31 = vmul.f32 %v5725_v23, %v1498_v21  ;;  %v3962_v62 = vcombine.low %v2052_v50, %v2053_v51  ;;  %v1977_v3 = vrot.slane %v1975_v52, 1  ;;  %v1918_v4 = vld [vmem:[#allocation3 + $0x1c] sm:$0x1]  ;;  %v1926_v61 = vld [vmem:[#allocation3 + $0x18] sm:$0xe]  ;;  %v1973_v1 = vshrl.u32 %v3944_v42, 16 }
 0x1ea   : > { %v1588_v63 = vsel %vm806_vm0, 0.0, %v1571_v24  ;;  %v1596_v13 = vsel %vm806_vm0, %v1571_v24, 0.0  ;;  %v1534_v2 = vmul.f32 %v5725_v23, %v1501_v58  ;;  %1681 = vst [vmem:[#allocation3 + $0x28] sm:$0xf] %v4137_v41  ;;  %1682 = vst [vmem:[#allocation3 + $0x2c] sm:$0x1] %v4138_v60  ;;  %v3954_v17 = vcombine.low %v1926_v61, %v1918_v4 }
 0x1eb   : > { %v4139_v5 = vpack.c.bf16 %v1588_v63, %v1588_v63  ;;  %v4140_v6 = vpack.c.bf16 %v1596_v13, %v1596_v13  ;;  %v1548_v8 = vadd.f32 %v5727_v28, %v1533_v31  ;;  %4459 = vmatprep.mubr.bf16.mxu1 %v3962_v62  ;;  %v5764_v10 = vld [vmem:[#allocation3 + $0x18] sm:$0xf]  ;;  %v1982_v7 = vshll.u32 %v3945_v0, 16  ;;  %v4866_v57 = vld [vmem:[#allocation12 + $0x88] sm:$0xff]  }
 0x1ec   : > { %v1549_v11 = vadd.f32 %v5727_v28, %v1534_v2  ;;  %v1980_v23 = vshrl.u32 %v3945_v0, 16  ;;  %v1927_v16 = vld [vmem:[#allocation3 + $0x20] sm:$0xe]  ;;  %v3946_v20 = vcombine.low %v5764_v10, %v1918_v4  ;;  %v1978_v26 = vor.u32 %v1977_v3, %v1973_v1 }
 0x1ed   : > { %1683 = vst [vmem:[#allocation3 + $0x30] sm:$0xf] %v4139_v5  ;;  %1684 = vst [vmem:[#allocation3 + $0x34] sm:$0x1] %v4140_v6  ;;  %v1556_v14 = vmax.f32 %v1548_v8, 0.0  ;;  %v1984_v38 = vrot.slane %v1982_v7, 1  ;;  %v3960_v58 = vcombine.low %v5748_v32, %v5751_v44 }
 0x1ee   : > { %v1919_v15 = vld [vmem:[#allocation3 + $0x24] sm:$0x1]  ;;  %v1557_v22 = vmax.f32 %v1549_v11, 0.0  ;;  %v5768_v9 = vld [vmem:[#allocation3 + $0x20] sm:$0xf]  ;;  %v2054_v54 = vrot.slane %v3954_v17, 1 }
 0x1ef   : > { %v3955_v45 = vcombine.low %v1927_v16, %v1919_v15  ;;  %v1572_v29 = vrot.slane %v1556_v14, 7  ;;  %v3947_v28 = vcombine.low %v5768_v9, %v1919_v15  ;;  %v1987_v59 = vshrl.u32 %v3946_v20, 16  ;;  %v5783_v4 = vld [vmem:[#allocation3] sm:$0xf]  ;;  %v1699_v5 = vld [vmem:[#allocation3 + $0x4] sm:$0x1] }
 0x1f0   : > { %v1573_v12 = vrot.slane %v1557_v22, 7  ;;  %v1985_v33 = vor.u32 %v1984_v38, %v1980_v23  ;;  %v1989_v55 = vshll.u32 %v3946_v20, 16  ;;  %v4865_v32 = vld [vmem:[#allocation12 + $0x8] sm:$0xff]   ;;  %v4872_v8 = vld [vmem:[#allocation12 + $0x90] sm:$0xff]  }
 0x1f1   : > { %v2055_v19 = vrot.slane %v3955_v45, 1  ;;  %v1589_v34 = vsel %vm806_vm0, 0.0, %v1572_v29  ;;  %v1597_v35 = vsel %vm806_vm0, %v1572_v29, 0.0  ;;  %v1994_v37 = vshrl.u32 %v3947_v28, 16  ;;  %v5775_v48 = vld [vmem:[#allocation3 + $0x28] sm:$0xf] }
 0x1f2   : > { %v1996_v40 = vshll.u32 %v3947_v28, 16  ;;  %v4141_v43 = vpack.c.bf16 %v1589_v34, %v1589_v34  ;;  %v4142_v42 = vpack.c.bf16 %v1597_v35, %v1597_v35  ;;  %v1590_v46 = vsel %vm806_vm0, 0.0, %v1573_v12  ;;  %v1920_v50 = vld [vmem:[#allocation3 + $0x2c] sm:$0x1]  ;;  %v1928_v24 = vld [vmem:[#allocation3 + $0x28] sm:$0xe] }
 0x1f3   : > { %v1598_v47 = vsel %vm806_vm0, %v1573_v12, 0.0  ;;  %v4143_v21 = vpack.c.bf16 %v1590_v46, %v1590_v46  ;;  %v3961_v0 = vcombine.low %v1978_v26, %v1985_v33  ;;  %v3965_v52 = vcombine.low %v2054_v54, %v2055_v19  ;;  %v1707_v11 = vld [vmem:[#allocation3] sm:$0xe]  ;;  %v5786_v14 = vld [vmem:[#allocation3 + $0x8] sm:$0xf]  ;;  %v4879_v12 = vld [vmem:[#allocation12 + $0x98] sm:$0xff]  }
 0x1f4   : > { %v4144_v51 = vpack.c.bf16 %v1598_v47, %v1598_v47  ;;  %1685 = vst [vmem:[#allocation3 + $0x38] sm:$0xf] %v4141_v43  ;;  %1686 = vst [vmem:[#allocation3 + $0x3c] sm:$0x1] %v4142_v42  ;;  %v1991_v41 = vrot.slane %v1989_v55, 1  ;;  %v1998_v60 = vrot.slane %v1996_v40, 1  ;;  %v3948_v63 = vcombine.low %v5775_v48, %v1920_v50 }
 0x1f5   : > { %v5779_v31 = vld [vmem:[#allocation3 + $0x30] sm:$0xf]  ;;  %v1921_v62 = vld [vmem:[#allocation3 + $0x34] sm:$0x1]  ;;  %1687 = vst [vmem:[#allocation3 + $0x40] sm:$0xf] %v4143_v21  ;;  %2325 = vmatprep.mubr.bf16.mxu0 %v3961_v0  ;;  %4460 = vmatmul.mubr.bf16.vlgmr.msra.gmra.mrb[32].mxu1 %v3965_v52  ;;  %v3956_v3 = vcombine.low %v1928_v24, %v1920_v50  ;;  %v3936_v19 = vcombine.low %v1707_v11, %v1699_v5 }
 0x1f6   : > { %1688 = vst [vmem:[#allocation3 + $0x44] sm:$0x1] %v4144_v51  ;;  %v1929_v13 = vld [vmem:[#allocation3 + $0x30] sm:$0xe]  ;;  %v3949_v2 = vcombine.low %v5779_v31, %v1921_v62  ;;  %2326 = vmatmul.mubr.bf16.vlgmr.msra.gmra.mrb[0].mxu0 %v3960_v58  ;;  %4468 = vmatpush3.bf16.msra.mxu1 %v5708_v56  ;;  %v1992_v44 = vor.u32 %v1991_v41, %v1987_v59  ;;  %v2003_v1 = vshll.u32 %v3948_v63, 16  ;;  %v4870_v16 = vld [vmem:[#allocation12 + $0x50] sm:$0xff]  }
 0x1f7   : > { %v1999_v6 = vor.u32 %v1998_v60, %v1994_v37  ;;  %v3957_v61 = vcombine.low %v1929_v13, %v1921_v62  ;;  %4294 = vmatpush3.bf16.msra.mxu0 %v4860_v36  ;;  %4469 = vmatprep.subr.bf16.mxu1 %v4866_v57  ;;  %v1700_v23 = vld [vmem:[#allocation3 + $0xc] sm:$0x1]  ;;  %v2056_v17 = vrot.slane %v3956_v3, 1  ;;  %v1708_v22 = vld [vmem:[#allocation3 + $0x8] sm:$0xe]  ;;  %v5789_v56 = vcombine.low %v5783_v4, %v1699_v5  ;;  %v4877_v59 = vld [vmem:[#allocation12 + $0x58] sm:$0xff]  }
 0x1f8   : > { %v2010_v7 = vshll.u32 %v3949_v2, 16  ;;  %4295 = vmatprep.subr.bf16.mxu0 %v4864_v53  ;;  %v2001_v26 = vshrl.u32 %v3948_v63, 16  ;;  %v2005_v38 = vrot.slane %v2003_v1, 1  ;;  %v2008_v45 = vshrl.u32 %v3949_v2, 16  ;;  %v4871_v54 = vld [vmem:[#allocation12 + $0x10] sm:$0xff]   ;;  %v4878_v24 = vld [vmem:[#allocation12 + $0x18] sm:$0xff]  }
 0x1f9   : > { %v3964_v15 = vcombine.low %v1992_v44, %v1999_v6  ;;  %v2057_v20 = vrot.slane %v3957_v61, 1  ;;  %v5792_v33 = vcombine.low %v5786_v14, %v1700_v23  ;;  %v3937_v40 = vcombine.low %v1708_v22, %v1700_v23  ;;  %v4881_v62 = vld [vmem:[#allocation12 + $0x60] sm:$0xff]   ;;  %v4895_v1 = vld [vmem:[#allocation12 + $0xa8] sm:$0xff]   ;;  %v5813_v22 = vld [vmem:[#allocation3 + $0x14] sm:$0x1] }
 0x1fa   : > { %v2012_v29 = vrot.slane %v2010_v7, 1  ;;  %4470 = vmatpush3.bf16.msra.mxu1 %v4866_v57  ;;  %v2006_v55 = vor.u32 %v2005_v38, %v2001_v26  ;;  %v3963_v43 = vcombine.low %v5764_v10, %v5768_v9  ;;  %v1835_v53 = vrot.slane %v3936_v19, 1  ;;  %v4883_v10 = vld [vmem:[#allocation12 + $0xa0] sm:$0xff]  }
 0x1fb   : > { %2333 = vmatprep.mubr.bf16.mxu0 %v3964_v15  ;;  %v3968_v28 = vcombine.low %v2056_v17, %v2057_v20  ;;  %4296 = vmatpush3.bf16.msra.mxu0 %v4865_v32  ;;  %v5794_v35 = vld [vmem:[#allocation3 + $0x38] sm:$0xf]  ;;  %v1922_v36 = vld [vmem:[#allocation3 + $0x3c] sm:$0x1]  ;;  %v1836_v41 = vrot.slane %v3937_v40, 1  ;;  %v1758_v13 = vshll.u32 %v5789_v56, 16  ;;  %v3966_v15 = vcombine.low %v5775_v48, %v5779_v31 }
 0x1fc   : > { %4471 = vmatprep.subr.bf16.mxu1 %v4872_v8  ;;  %v2013_v34 = vor.u32 %v2012_v29, %v2008_v45  ;;  %v1930_v37 = vld [vmem:[#allocation3 + $0x38] sm:$0xe]  ;;  %4297 = vmatprep.subr.bf16.mxu0 %v4870_v16  ;;  %v5798_v42 = vld [vmem:[#allocation3 + $0x40] sm:$0xf]  ;;  %v3950_v50 = vcombine.low %v5794_v35, %v1922_v36  ;;  %v1765_v2 = vshll.u32 %v5792_v33, 16  ;;  %v1756_v17 = vshrl.u32 %v5789_v56, 16 }
 0x1fd   : > { %4463 = vmatprep.mubr.bf16.mxu1 %v3968_v28  ;;  %v1923_v46 = vld [vmem:[#allocation3 + $0x44] sm:$0x1]  ;;  %v1931_v47 = vld [vmem:[#allocation3 + $0x40] sm:$0xe]  ;;  %v3958_v21 = vcombine.low %v1930_v37, %v1922_v36  ;;  %v5804_v6 = vld [vmem:[#allocation3 + $0x18] sm:$0xf]  ;;  %v3998_v11 = vcombine.low %v1835_v53, %v1836_v41 }
 0x1fe   : > { %v3967_v51 = vcombine.low %v2006_v55, %v2013_v34  ;;  %v3951_v0 = vcombine.low %v5798_v42, %v1923_v46  ;;  %v3959_v52 = vcombine.low %v1931_v47, %v1923_v46  ;;  %2334 = vmatmul.mubr.bf16.gmra.mrb[4].mxu0 %v3963_v43  ;;  %4472 = vmatpush3.bf16.msra.mxu1 %v4872_v8  ;;  %v2017_v57 = vshll.u32 %v3950_v50, 16  ;;  %v5806_v8 = vld [vmem:[#allocation3 + $0x1c] sm:$0x1]  ;;  %v4888_v16 = vld [vmem:[#allocation12 + $0x68] sm:$0xff]   ;;  %v5811_v20 = vld [vmem:[#allocation3 + $0x10] sm:$0xf] }
 0x1ff   : > { %4298 = vmatpush3.bf16.msra.mxu0 %v4871_v54  ;;  %4473 = vmatprep.subr.bf16.mxu1 %v4879_v12  ;;  %v2058_v9 = vrot.slane %v3958_v21, 1  ;;  %v2015_v5 = vshrl.u32 %v3950_v50, 16  ;;  %v4882_v61 = vld [vmem:[#allocation12 + $0x20] sm:$0xff]   ;;  %v1760_v38 = vrot.slane %v1758_v13, 1  ;;  %v1767_v45 = vrot.slane %v1765_v2, 1  ;;  %v4894_v48 = vld [vmem:[#allocation12 + $0x28] sm:$0xff]  }
 0x200   : > { %v2059_v58 = vrot.slane %v3959_v52, 1  ;;  %v2024_v60 = vshll.u32 %v3951_v0, 16  ;;  %4299 = vmatprep.subr.bf16.mxu0 %v4877_v59  ;;  %2341 = vmatprep.mubr.bf16.mxu0 %v3967_v51  ;;  %v2019_v63 = vrot.slane %v2017_v57, 1  ;;  %v2022_v32 = vshrl.u32 %v3951_v0, 16  ;;  %v4899_v54 = vld [vmem:[#allocation12 + $0xb0] sm:$0xff]   ;;  %v4900_v51 = vld [vmem:[#allocation12 + $0x78] sm:$0xff]  }
 0x201   : > { %v3931_v29 = vcombine.low %v5804_v6, %v5806_v8  ;;  %v1763_v31 = vshrl.u32 %v5792_v33, 16  ;;  %v3930_v56 = vcombine.low %v5811_v20, %v5813_v22  ;;  %v4897_v28 = vld [vmem:[#allocation12 + $0x70] sm:$0xff]   ;;  %v1710_v59 = vld [vmem:[#allocation3 + $0x18] sm:$0xe]  ;;  %v1709_v37 = vld [vmem:[#allocation3 + $0x10] sm:$0xe]  ;;  %v3969_v21 = vcombine.low %v5794_v35, %v5798_v42 }
 0x202   : > { %v3971_v3 = vcombine.low %v2058_v9, %v2059_v58  ;;  %v2026_v44 = vrot.slane %v2024_v60, 1  ;;  %4474 = vmatpush3.bf16.msra.mxu1 %v4879_v12  ;;  %v2020_v7 = vor.u32 %v2019_v63, %v2015_v5  ;;  %v1761_v12 = vor.u32 %v1760_v38, %v1756_v17  ;;  %v1704_v34 = vld [vmem:[#allocation3 + $0x2c] sm:$0x1]  ;;  %v1712_v36 = vld [vmem:[#allocation3 + $0x28] sm:$0xe]  ;;  %v4902_v0 = vld [vmem:[#allocation12 + $0xb8] sm:$0xff]  }
 0x203   : > { %4300 = vmatpush3.bf16.msra.mxu0 %v4878_v24  ;;  %4475 = vmatprep.subr.bf16.mxu1 %v4883_v10  ;;  %v1768_v19 = vor.u32 %v1767_v45, %v1763_v31  ;;  %v1779_v55 = vshll.u32 %v3931_v29, 16  ;;  %v5820_v40 = vld [vmem:[#allocation3 + $0x28] sm:$0xf]  ;;  %v1772_v33 = vshll.u32 %v3930_v56, 16  ;;  %v3939_v46 = vcombine.low %v1710_v59, %v5806_v8  ;;  %v1703_v47 = vld [vmem:[#allocation3 + $0x24] sm:$0x1] }
 0x204   : > { %v2027_v23 = vor.u32 %v2026_v44, %v2022_v32  ;;  %4301 = vmatprep.subr.bf16.mxu0 %v4881_v62  ;;  %4464 = vmatmul.mubr.bf16.gmra.mrb[36].mxu1 %v3971_v3  ;;  %v4898_v43 = vld [vmem:[#allocation12 + $0x30] sm:$0xff]   ;;  %v1711_v50 = vld [vmem:[#allocation3 + $0x20] sm:$0xe]  ;;  %v3941_v53 = vcombine.low %v1712_v36, %v1704_v34  ;;  %v5829_v9 = vcombine.low %v5820_v40, %v1704_v34  ;;  %v4901_v58 = vld [vmem:[#allocation12 + $0x38] sm:$0xff]   ;;  %v1777_v42 = vshrl.u32 %v3931_v29, 16 }
 0x205   : > { %4483 = vmatprep.mubr.bf16.mxu1 %v3998_v11  ;;  %v5825_v52 = vld [vmem:[#allocation3 + $0x20] sm:$0xf]  ;;  %v3997_v57 = vcombine.low %v1761_v12, %v1768_v19  ;;  %v1781_v24 = vrot.slane %v1779_v55, 1  ;;  %v3940_v41 = vcombine.low %v1711_v50, %v1703_v47  ;;  %v1774_v35 = vrot.slane %v1772_v33, 1  ;;  %v4909_v62 = vld [vmem:[#allocation12 + $0x200] sm:$0xff]  }
 0x206   : > { %v3970_v26 = vcombine.low %v2020_v7, %v2027_v23  ;;  %2342 = vmatmul.mubr.bf16.gmra.mrb[8].mxu0 %v3966_v15  ;;  %4476 = vmatpush3.bf16.msra.mxu1 %v4883_v10  ;;  %v3938_v10 = vcombine.low %v1709_v37, %v5813_v22  ;;  %v1838_v60 = vrot.slane %v3939_v46, 1  ;;  %v5832_v63 = vcombine.low %v5825_v52, %v1703_v47  ;;  %v5834_v13 = vld [vmem:[#allocation3 + $0x1c] sm:$0x1]  ;;  %v1705_v5 = vld [vmem:[#allocation3 + $0x34] sm:$0x1]  ;;  %v4916_v19 = vld [vmem:[#allocation12 + $0x208] sm:$0xff]  }
 0x207   : > { %4302 = vmatpush3.bf16.msra.mxu0 %v4882_v61  ;;  %4477 = vmatprep.subr.bf16.mxu1 %v4895_v1  ;;  %v4903_v2 = vld [vmem:[#allocation12 + $0x1c0] sm:$0xff]   ;;  %v1840_v3 = vrot.slane %v3941_v53, 1  ;;  %v1770_v8 = vshrl.u32 %v3930_v56, 16  ;;  %v1782_v61 = vor.u32 %v1781_v24, %v1777_v42  ;;  %v1839_v23 = vrot.slane %v3940_v41, 1  ;;  %v2730_v29 = vld [vmem:[#allocation3 + $0x14] sm:$0x1] }
 0x208   : > { %4303 = vmatprep.subr.bf16.mxu0 %v4888_v16  ;;  %2349 = vmatprep.mubr.bf16.mxu0 %v3970_v26  ;;  %v1706_v32 = vld [vmem:[#allocation3 + $0x3c] sm:$0x1]  ;;  %v1714_v44 = vld [vmem:[#allocation3 + $0x38] sm:$0xe]  ;;  %v1837_v11 = vrot.slane %v3938_v10, 1  ;;  %v1786_v38 = vshll.u32 %v5832_v63, 16  ;;  %v3996_v31 = vcombine.low %v5783_v4, %v5786_v14  ;;  %v3999_v42 = vcombine.low %v5811_v20, %v5804_v6 }
 0x209   : > { %v2739_v7 = vld [vmem:[#allocation3 + $0x18] sm:$0xe]  ;;  %v1713_v16 = vld [vmem:[#allocation3 + $0x30] sm:$0xe]  ;;  %v1775_v17 = vor.u32 %v1774_v35, %v1770_v8  ;;  %v3943_v45 = vcombine.low %v1714_v44, %v1706_v32  ;;  %v4914_v56 = vld [vmem:[#allocation12 + $0x1c8] sm:$0xff]  }
 0x20a   : > { %4478 = vmatpush3.bf16.msra.mxu1 %v4895_v1  ;;  %v1793_v1 = vshll.u32 %v5829_v9, 16  ;;  %v5837_v15 = vld [vmem:[#allocation3 + $0x38] sm:$0xf]  ;;  %v4001_v26 = vcombine.low %v1837_v11, %v1838_v60  ;;  %v4041_v59 = vcombine.low %v2739_v7, %v5834_v13  ;;  %v3942_v36 = vcombine.low %v1713_v16, %v1705_v5  ;;  %v4915_v4 = vld [vmem:[#allocation12 + $0x188] sm:$0xff]   ;;  %v4918_v47 = vld [vmem:[#allocation12 + $0x1d0] sm:$0xff]  }
 0x20b   : > { %4304 = vmatpush3.bf16.msra.mxu0 %v4894_v48  ;;  %4479 = vmatprep.subr.bf16.mxu1 %v4899_v54  ;;  %v4908_v22 = vld [vmem:[#allocation12 + $0x180] sm:$0xff]   ;;  %v2738_v48 = vld [vmem:[#allocation3 + $0x10] sm:$0xe]  ;;  %v4000_v12 = vcombine.low %v1775_v17, %v1782_v61  ;;  %v3935_v34 = vcombine.low %v5837_v15, %v1706_v32  ;;  %v1788_v14 = vrot.slane %v1786_v38, 1  ;;  %v1842_v46 = vrot.slane %v3943_v45, 1  ;;  %v4924_v53 = vld [vmem:[#allocation12 + $0x210] sm:$0xff]  }
 0x20c   : > { %4305 = vmatprep.subr.bf16.mxu0 %v4897_v28  ;;  %v5842_v28 = vld [vmem:[#allocation3 + $0x30] sm:$0xf]  ;;  %v1795_v55 = vrot.slane %v1793_v1, 1  ;;  %v4040_v37 = vcombine.low %v2738_v48, %v2730_v29  ;;  %v2867_v50 = vrot.slane %v4041_v59, 1  ;;  %v5849_v24 = vld [vmem:[#allocation3 + $0x18] sm:$0xf]  ;;  %v4002_v38 = vcombine.low %v5825_v52, %v5820_v40 }
 0x20d   : > { %v3934_v33 = vcombine.low %v5842_v28, %v1705_v5  ;;  %v5853_v60 = vld [vmem:[#allocation3 + $0x10] sm:$0xf]  ;;  %v1805_v8 = vshrl.u32 %v3935_v34, 16  ;;  %v4934_v61 = vld [vmem:[#allocation12 + $0x1e0] sm:$0xff]   ;;  %v5860_v16 = vld [vmem:[#allocation3 + $0x2c] sm:$0x1] }
 0x20e   : > { %2350 = vmatmul.mubr.bf16.gmra.mrb[12].mxu0 %v3969_v21  ;;  %4480 = vmatpush3.bf16.msra.mxu1 %v4899_v54  ;;  %v4004_v54 = vcombine.low %v1839_v23, %v1840_v3  ;;  %v1784_v21 = vshrl.u32 %v5832_v63, 16  ;;  %v2866_v10 = vrot.slane %v4040_v37, 1  ;;  %v4930_v63 = vld [vmem:[#allocation12 + $0x1d8] sm:$0xff]   ;;  %v4033_v3 = vcombine.low %v5849_v24, %v5834_v13  ;;  %v4936_v7 = vld [vmem:[#allocation12 + $0x220] sm:$0xff]   ;;  %v5858_v13 = vld [vmem:[#allocation3 + $0x28] sm:$0xf] }
 0x20f   : > { %4306 = vmatpush3.bf16.msra.mxu0 %v4898_v43  ;;  %2623 = vmatprep.mubr.bf16.mxu0 %v3997_v57  ;;  %v1791_v43 = vshrl.u32 %v5829_v9, 16  ;;  %v1807_v57 = vshll.u32 %v3935_v34, 16  ;;  %v4919_v9 = vld [vmem:[#allocation12 + $0x190] sm:$0xff]   ;;  %v1800_v35 = vshll.u32 %v3934_v33, 16  ;;  %v4932_v5 = vld [vmem:[#allocation12 + $0x218] sm:$0xff]   ;;  %v4032_v44 = vcombine.low %v5853_v60, %v2730_v29  ;;  %v4937_v45 = vld [vmem:[#allocation12 + $0x1e8] sm:$0xff]  }
 0x210   : > { %4307 = vmatprep.subr.bf16.mxu0 %v4900_v51  ;;  %4481 = vmatprep.subr.bf16.mxu1 %v4902_v0  ;;  %v4931_v6 = vld [vmem:[#allocation12 + $0x198] sm:$0xff]   ;;  %v1798_v11 = vshrl.u32 %v3934_v33, 16  ;;  %v2796_v23 = vshll.u32 %v4033_v3, 16  ;;  %v5864_v29 = vld [vmem:[#allocation3 + $0x20] sm:$0xf]  ;;  %v4035_v59 = vcombine.low %v5858_v13, %v5860_v16  ;;  %v4941_v52 = vld [vmem:[#allocation12 + $0x1f0] sm:$0xff]  }
 0x211   : > { %v1796_v51 = vor.u32 %v1795_v55, %v1791_v43  ;;  %v1809_v32 = vrot.slane %v1807_v57, 1  ;;  %v1802_v20 = vrot.slane %v1800_v35, 1  ;;  %v5866_v48 = vld [vmem:[#allocation3 + $0x24] sm:$0x1]  ;;  %v2794_v55 = vshrl.u32 %v4033_v3, 16  ;;  %v4943_v37 = vld [vmem:[#allocation12 + $0x230] sm:$0xff]  }
 0x212   : > { %4482 = vmatpush3.bf16.msra.mxu1 %v4902_v0  ;;  %v1841_v0 = vrot.slane %v3942_v36, 1  ;;  %v4034_v40 = vcombine.low %v5864_v29, %v5866_v48  ;;  %v2787_v34 = vshrl.u32 %v4032_v44, 16  ;;  %v5872_v43 = vld [vmem:[#allocation3 + $0x38] sm:$0xf]  ;;  %v2735_v33 = vld [vmem:[#allocation3 + $0x3c] sm:$0x1] }
 0x213   : > { %4308 = vmatpush3.bf16.msra.mxu0 %v4901_v58  ;;  %4491 = vmatprep.subr.bf16.mxu1 %v4909_v62  ;;  %v1789_v58 = vor.u32 %v1788_v14, %v1784_v21  ;;  %v1810_v1 = vor.u32 %v1809_v32, %v1805_v8  ;;  %v1803_v17 = vor.u32 %v1802_v20, %v1798_v11  ;;  %v2810_v14 = vshll.u32 %v4035_v59, 16  ;;  %v2737_v20 = vld [vmem:[#allocation3 + $0x4c] sm:$0x1] }
 0x214   : > { %4345 = vmatprep.subr.bf16.mxu0 %v4903_v2  ;;  %v4007_v41 = vcombine.low %v1841_v0, %v1842_v46  ;;  %v4942_v46 = vld [vmem:[#allocation12 + $0x1b0] sm:$0xff]   ;;  %v2803_v21 = vshll.u32 %v4034_v40, 16  ;;  %v4005_v0 = vcombine.low %v5842_v28, %v5837_v15  ;;  %v4945_v15 = vld [vmem:[#allocation12 + $0x1b8] sm:$0xff]   ;;  %v2808_v3 = vshrl.u32 %v4035_v59, 16 }
 0x215   : > { %4484 = vmatmul.mubr.bf16.vlgmr.msra.gmra.mrb[32].mxu1 %v4001_v26  ;;  %v4003_v2 = vcombine.low %v1789_v58, %v1796_v51  ;;  %v2789_v26 = vshll.u32 %v4032_v44, 16  ;;  %v2743_v51 = vld [vmem:[#allocation3 + $0x38] sm:$0xe]  ;;  %v2734_v58 = vld [vmem:[#allocation3 + $0x34] sm:$0x1]  ;;  %v2812_v35 = vrot.slane %v2810_v14, 1 }
 0x216   : > { %2624 = vmatmul.mubr.bf16.vlgmr.msra.gmra.mrb[16].mxu0 %v3996_v31  ;;  %4487 = vmatprep.mubr.bf16.mxu1 %v4004_v54  ;;  %v4006_v31 = vcombine.low %v1803_v17, %v1810_v1  ;;  %v4939_v54 = vld [vmem:[#allocation12 + $0x228] sm:$0xff]   ;;  %v2805_v28 = vrot.slane %v2803_v21, 1  ;;  %v2801_v8 = vshrl.u32 %v4034_v40, 16 }
 0x217   : > { %2631 = vmatprep.mubr.bf16.mxu0 %v4000_v12  ;;  %4346 = vmatpush3.bf16.msra.mxu0 %v4908_v22  ;;  %v4935_v22 = vld [vmem:[#allocation12 + $0x1a0] sm:$0xff]   ;;  %v4938_v12 = vld [vmem:[#allocation12 + $0x1a8] sm:$0xff]  }
 0x218   : > { %4492 = vmatpush3.bf16.msra.mxu1 %v4909_v62  ;;  %4347 = vmatprep.subr.bf16.mxu0 %v4914_v56  ;;  %v4050_v62 = vcombine.low %v2866_v10, %v2867_v50  ;;  %v2798_v56 = vrot.slane %v2796_v23, 1  ;;  %v2740_v50 = vld [vmem:[#allocation3 + $0x20] sm:$0xe]  ;;  %v5877_v10 = vld [vmem:[#allocation3 + $0x30] sm:$0xf] }
 0x219   : > { %4493 = vmatprep.subr.bf16.mxu1 %v4916_v19  ;;  %v2728_v1 = vld [vmem:[#allocation3 + $0x40] sm:$0xf]  ;;  %v2736_v17 = vld [vmem:[#allocation3 + $0x44] sm:$0x1] }
 0x21a   : > { %v2799_v36 = vor.u32 %v2798_v56, %v2794_v55 }
 0x21b   : > { %4348 = vmatpush3.bf16.msra.mxu0 %v4915_v4  ;;  %v2741_v4 = vld [vmem:[#allocation3 + $0x28] sm:$0xe] }
 0x21c   : > { %4494 = vmatpush3.bf16.msra.mxu1 %v4916_v19  ;;  %4349 = vmatprep.subr.bf16.mxu0 %v4918_v47  ;;  %v2791_v19 = vrot.slane %v2789_v26, 1  ;;  %v4043_v57 = vcombine.low %v2741_v4, %v5860_v16  ;;  %v2806_v26 = vor.u32 %v2805_v28, %v2801_v8  ;;  %v3349_v8 = vld [vmem:[%s6127_s13 + $0x8] sm:$0xff] }
 0x21d   : > { %4488 = vmatmul.mubr.bf16.gmra.mrb[36].mxu1 %v4007_v41  ;;  %4495 = vmatprep.subr.bf16.mxu1 %v4924_v53  ;;  %v4946_v41 = vld [vmem:[#allocation12 + $0x238] sm:$0xff]  }
 0x21e   : > { %2632 = vmatmul.mubr.bf16.gmra.mrb[20].mxu0 %v3999_v42  ;;  %4507 = vmatprep.mubr.bf16.mxu1 %v4050_v62  ;;  %v2792_v47 = vor.u32 %v2791_v19, %v2787_v34  ;;  %v2742_v42 = vld [vmem:[#allocation3 + $0x30] sm:$0xe]  ;;  %v4037_v62 = vcombine.low %v5872_v43, %v2735_v33  ;;  %v2869_v32 = vrot.slane %v4043_v57, 1  ;;  %v4038_v19 = vcombine.low %v2728_v1, %v2736_v17 }
 0x21f   : > { %2639 = vmatprep.mubr.bf16.mxu0 %v4003_v2  ;;  %4350 = vmatpush3.bf16.msra.mxu0 %v4919_v9  ;;  %v4045_v2 = vcombine.low %v2743_v51, %v2735_v33  ;;  %v4044_v44 = vcombine.low %v2742_v42, %v2734_v58  ;;  %v3262_v42 = vld [vmem:[%s6092_s10 + $0x10] sm:$0xff] }
 0x220   : > { %4496 = vmatpush3.bf16.msra.mxu1 %v4924_v53  ;;  %4351 = vmatprep.subr.bf16.mxu0 %v4930_v63  ;;  %v4944_v53 = vld [vmem:[#allocation12 + $0x1f8] sm:$0xff]   ;;  %v4049_v9 = vcombine.low %v2792_v47, %v2799_v36  ;;  %v4042_v63 = vcombine.low %v2740_v50, %v5866_v48  ;;  %v2824_v11 = vshll.u32 %v4037_v62, 16  ;;  %v4048_v48 = vcombine.low %v5853_v60, %v5849_v24 }
 0x221   : > { %4497 = vmatprep.subr.bf16.mxu1 %v4932_v5  ;;  %v2871_v16 = vrot.slane %v4045_v2, 1  ;;  %v2822_v34 = vshrl.u32 %v4037_v62, 16  ;;  %v2831_v14 = vshll.u32 %v4038_v19, 16  ;;  %v3265_v2 = vld [vmem:[%s6092_s10 + $0x28] sm:$0xff] }
 0x222   : > { %v2868_v23 = vrot.slane %v4042_v63, 1  ;;  %v3264_v63 = vld [vmem:[%s6092_s10 + $0x20] sm:$0xff] }
 0x223   : > { %4352 = vmatpush3.bf16.msra.mxu0 %v4931_v6  ;;  %v2729_v6 = vld [vmem:[#allocation3 + $0x48] sm:$0xf]  ;;  %v2833_v51 = vrot.slane %v2831_v14, 1  ;;  %v4616_v28 = vpack.c.bf16 %v3265_v2, %v3264_v63 }
 0x224   : > { %4498 = vmatpush3.bf16.msra.mxu1 %v4932_v5  ;;  %4353 = vmatprep.subr.bf16.mxu0 %v4934_v61  ;;  %v4036_v5 = vcombine.low %v5877_v10, %v2734_v58  ;;  %v2813_v61 = vor.u32 %v2812_v35, %v2808_v3  ;;  %v4057_v35 = vcombine.low %v2728_v1, %v2729_v6  ;;  %v3267_v3 = vld [vmem:[%s6092_s10 + $0x38] sm:$0xff] }
 0x225   : > { %4499 = vmatprep.subr.bf16.mxu1 %v4936_v7 }
 0x226   : > { %2640 = vmatmul.mubr.bf16.gmra.mrb[24].mxu0 %v4002_v38  ;;  %v2817_v38 = vshll.u32 %v4036_v5, 16  ;;  %v4052_v59 = vcombine.low %v2806_v26, %v2813_v61  ;;  %v2815_v36 = vshrl.u32 %v4036_v5, 16  ;;  %v5177_v5 = vmov 0.0   ;;  %v3350_v61 = vld [vmem:[%s6127_s13 + $0x10] sm:$0xff]  ;;  %v3353_v26 = vld [vmem:[%s6127_s13 + $0x28] sm:$0xff] }
 0x227   : > { %2647 = vmatprep.mubr.bf16.mxu0 %v4006_v31  ;;  %4354 = vmatpush3.bf16.msra.mxu0 %v4935_v22  ;;  %v2744_v22 = vld [vmem:[#allocation3 + $0x40] sm:$0xe]  ;;  %v4053_v31 = vcombine.low %v2868_v23, %v2869_v32  ;;  %v3270_v23 = vld [vmem:[%s6092_s10 + $0x50] sm:$0xff] }
 0x228   : > { %4500 = vmatpush3.bf16.msra.mxu1 %v4936_v7  ;;  %4355 = vmatprep.subr.bf16.mxu0 %v4937_v45  ;;  %v2745_v7 = vld [vmem:[#allocation3 + $0x48] sm:$0xe]  ;;  %v4039_v45 = vcombine.low %v2729_v6, %v2737_v20  ;;  %v4046_v55 = vcombine.low %v2744_v22, %v2736_v17  ;;  %v3269_v6 = vld [vmem:[%s6092_s10 + $0x48] sm:$0xff]  ;;  %v3352_v22 = vld [vmem:[%s6127_s13 + $0x20] sm:$0xff] }
 0x229   : > { %4501 = vmatprep.subr.bf16.mxu1 %v4939_v54  ;;  %v4047_v56 = vcombine.low %v2745_v7, %v2737_v20  ;;  %v3348_v20 = vld [vmem:[%s6127_s13] sm:$0xff]  ;;  %v3351_v7 = vld [vmem:[%s6127_s13 + $0x18] sm:$0xff] }
 0x22a   : > { %v2838_v60 = vshll.u32 %v4039_v45, 16  ;;  %v2872_v4 = vrot.slane %v4046_v55, 1  ;;  %v2836_v47 = vshrl.u32 %v4039_v45, 16  ;;  %v4634_v1 = vpack.c.bf16 %v3349_v8, %v3348_v20  ;;  %v3272_v45 = vld [vmem:[%s6092_s10 + $0x60] sm:$0xff] }
 0x22b   : > { %4356 = vmatpush3.bf16.msra.mxu0 %v4938_v12  ;;  %v2826_v12 = vrot.slane %v2824_v11, 1  ;;  %v2873_v24 = vrot.slane %v4047_v56, 1  ;;  %v4637_v17 = vpack.c.bf16 %v3351_v7, %v3350_v61  ;;  %v3355_v56 = vld [vmem:[%s6127_s13 + $0x38] sm:$0xff] }
 0x22c   : > { %4502 = vmatpush3.bf16.msra.mxu1 %v4939_v54  ;;  %4357 = vmatprep.subr.bf16.mxu0 %v4941_v52  ;;  %v2870_v54 = vrot.slane %v4044_v44, 1  ;;  %v2819_v52 = vrot.slane %v2817_v38, 1  ;;  %v3268_v44 = vld [vmem:[%s6092_s10 + $0x40] sm:$0xff] }
 0x22d   : > { %4503 = vmatprep.subr.bf16.mxu1 %v4943_v37  ;;  %v4059_v21 = vcombine.low %v2872_v4, %v2873_v24  ;;  %v4622_v11 = vpack.c.bf16 %v3269_v6, %v3268_v44 }
 0x22e   : > { %2648 = vmatmul.mubr.bf16.gmra.mrb[28].mxu0 %v4005_v0  ;;  %v4056_v40 = vcombine.low %v2870_v54, %v2871_v16  ;;  %v2820_v33 = vor.u32 %v2819_v52, %v2815_v36  ;;  %v2840_v0 = vrot.slane %v2838_v60, 1  ;;  %v3271_v16 = vld [vmem:[%s6092_s10 + $0x58] sm:$0xff]  ;;  %v3354_v54 = vld [vmem:[%s6127_s13 + $0x30] sm:$0xff]  ;;  %v3357_v52 = vld [vmem:[%s6127_s13 + $0x48] sm:$0xff] }
 0x22f   : > { %4358 = vmatpush3.bf16.msra.mxu0 %v4942_v46  ;;  %3139 = vmatprep.mubr.bf16.mxu0 %v4049_v9  ;;  %v4051_v46 = vcombine.low %v5864_v29, %v5858_v13  ;;  %v4054_v9 = vcombine.low %v5877_v10, %v5872_v43  ;;  %v3260_v13 = vld [vmem:[%s6092_s10] sm:$0xff]  ;;  %v3261_v29 = vld [vmem:[%s6092_s10 + $0x8] sm:$0xff]  ;;  %v3263_v43 = vld [vmem:[%s6092_s10 + $0x18] sm:$0xff]  ;;  %v4625_v38 = vpack.c.bf16 %v3271_v16, %v3270_v23 }
 0x230   : > { %4504 = vmatpush3.bf16.msra.mxu1 %v4943_v37  ;;  %4359 = vmatprep.subr.bf16.mxu0 %v4944_v53  ;;  %v2827_v37 = vor.u32 %v2826_v12, %v2822_v34  ;;  %v2829_v53 = vshrl.u32 %v4038_v19, 16  ;;  %v2841_v58 = vor.u32 %v2840_v0, %v2836_v47  ;;  %v4610_v62 = vpack.c.bf16 %v3261_v29, %v3260_v13  ;;  %v3274_v12 = vld [vmem:[%s6092_s10 + $0x70] sm:$0xff]  ;;  %v3275_v19 = vld [vmem:[%s6092_s10 + $0x78] sm:$0xff]  ;;  %v3361_v0 = vld [vmem:[%s6127_s13 + $0x68] sm:$0xff] }
 0x231   : > { %4505 = vmatprep.subr.bf16.mxu1 %v4946_v41  ;;  %v4613_v10 = vpack.c.bf16 %v3263_v43, %v3262_v42  ;;  %v4643_v55 = vpack.c.bf16 %v3355_v56, %v3354_v54  ;;  %v4631_v34 = vpack.c.bf16 %v3275_v19, %v3274_v12  ;;  %v5978_v60 = vld [vmem:[#allocation8] sm:$0xff]  }
 0x232   : > { %v4055_v50 = vcombine.low %v2820_v33, %v2827_v37  ;;  %v2834_v57 = vor.u32 %v2833_v51, %v2829_v53  ;;  %v3358_v33 = vld [vmem:[%s6127_s13 + $0x50] sm:$0xff]  ;;  %v3360_v51 = vld [vmem:[%s6127_s13 + $0x60] sm:$0xff] }
 0x233   : > { %4360 = vmatpush3.bf16.msra.mxu0 %v4945_v15  ;;  %v3266_v15 = vld [vmem:[%s6092_s10 + $0x30] sm:$0xff] }
 0x234   : > { %4506 = vmatpush3.bf16.msra.mxu1 %v4946_v41  ;;  %4609 = vmatprep.subr.bf16.mxu0 %v5175_v39  ;;  %v4058_v41 = vcombine.low %v2834_v57, %v2841_v58  ;;  %v4619_v32 = vpack.c.bf16 %v3267_v3, %v3266_v15  ;;  %v4652_v58 = vpack.c.bf16 %v3361_v0, %v3360_v51 }
 0x235   : > { %4633 = vmatprep.subr.bf16.mxu1 %v5175_v39 }
 0x236   : > { %3140 = vmatmul.mubr.bf16.vlgmr.msra.gmra.mrb[32].mxu0 %v4048_v48  ;;  %v3273_v48 = vld [vmem:[%s6092_s10 + $0x68] sm:$0xff] }
 0x237   : > { %3147 = vmatprep.mubr.bf16.mxu0 %v4052_v59  ;;  %4508 = vmatmul.mubr.bf16.vlgmr.msra.gmra.mrb[32].mxu1 %v4053_v31  ;;  %v4640_v31 = vpack.c.bf16 %v3353_v26, %v3352_v22  ;;  %v4628_v59 = vpack.c.bf16 %v3273_v48, %v3272_v45 }
 0x238   : > { %4511 = vmatprep.mubr.bf16.mxu1 %v4056_v40  ;;  %4611 = vmatpush3.bf16.msra.mxu0 %v4610_v62  ;;  %v3356_v40 = vld [vmem:[%s6127_s13 + $0x40] sm:$0xff] }
 0x239   : > { %4612 = vmatprep.subr.bf16.mxu0 %v5175_v39  ;;  %4635 = vmatpush3.bf16.msra.mxu1 %v4634_v1  ;;  %v4646_v37 = vpack.c.bf16 %v3357_v52, %v3356_v40 }
 0x23a   : > { %4636 = vmatprep.subr.bf16.mxu1 %v5175_v39 }
 0x23c   : > { %4614 = vmatpush3.bf16.msra.mxu0 %v4613_v10 }
 0x23d   : > { %4615 = vmatprep.subr.bf16.mxu0 %v5175_v39  ;;  %4638 = vmatpush3.bf16.msra.mxu1 %v4637_v17 }
 0x23e   : > { %3148 = vmatmul.mubr.bf16.gmra.mrb[36].mxu0 %v4051_v46  ;;  %4639 = vmatprep.subr.bf16.mxu1 %v5175_v39  ;;  %v3359_v46 = vld [vmem:[%s6127_s13 + $0x58] sm:$0xff] }
 0x23f   : > { %3155 = vmatprep.mubr.bf16.mxu0 %v4055_v50  ;;  %4512 = vmatmul.mubr.bf16.gmra.mrb[36].mxu1 %v4059_v21  ;;  %v4649_v21 = vpack.c.bf16 %v3359_v46, %v3358_v33 }
 0x240   : > { %4582 = vmatprep.mubr.msk.f32.mxu1 %vm5176_vm4, %v5177_v5  ;;  %4617 = vmatpush3.bf16.msra.mxu0 %v4616_v28 }
 0x241   : > { %4618 = vmatprep.subr.bf16.mxu0 %v5175_v39  ;;  %4641 = vmatpush3.bf16.msra.mxu1 %v4640_v31 }
 0x242   : > { %4642 = vmatprep.subr.bf16.mxu1 %v5175_v39 }
 0x244   : > { %4620 = vmatpush3.bf16.msra.mxu0 %v4619_v32 }
 0x245   : > { %4621 = vmatprep.subr.bf16.mxu0 %v5175_v39  ;;  %4644 = vmatpush3.bf16.msra.mxu1 %v4643_v55 }
 0x246   : > { %3156 = vmatmul.mubr.bf16.gmra.mrb[40].mxu0 %v4054_v9  ;;  %4645 = vmatprep.subr.bf16.mxu1 %v5175_v39 }
 0x247   : > { %3163 = vmatprep.mubr.bf16.mxu0 %v4058_v41 }
 0x248   : > { %4623 = vmatpush3.bf16.msra.mxu0 %v4622_v11 }
 0x249   : > { %4624 = vmatprep.subr.bf16.mxu0 %v5175_v39  ;;  %4647 = vmatpush3.bf16.msra.mxu1 %v4646_v37 }
 0x24a   : > { %4648 = vmatprep.subr.bf16.mxu1 %v5175_v39 }
 0x24c   : > { %4626 = vmatpush3.bf16.msra.mxu0 %v4625_v38 }
 0x24d   : > { %4627 = vmatprep.subr.bf16.mxu0 %v5175_v39  ;;  %4650 = vmatpush3.bf16.msra.mxu1 %v4649_v21 }
 0x24e   : > { %3164 = vmatmul.mubr.bf16.gmra.mrb[44].mxu0 %v4057_v35  ;;  %4651 = vmatprep.subr.bf16.mxu1 %v5175_v39 }
 0x24f   : > { %4547 = vmatprep.mubr.msk.f32.mxu0 %vm5176_vm4, %v5177_v5 }
 0x250   : > { %4629 = vmatpush3.bf16.msra.mxu0 %v4628_v59 }
 0x251   : > { %4630 = vmatprep.subr.bf16.mxu0 %v5175_v39  ;;  %4653 = vmatpush3.bf16.msra.mxu1 %v4652_v58 }
 0x252   : > { %4654 = vmatprep.subr.bf16.mxu1 %v5175_v39 }
 0x254   : > { %4632 = vmatpush3.bf16.msra.mxu0 %v4631_v34 }
 0x255   : > { %4585 = vmatprep.subr.bf16.mxu0 %v5978_v60 }
 0x2c9   : > { %v4257_v24 = vpop.f32.mrb[0].mxu0 }
 0x2ca   : > { %v4258_v36 = vpop.f32.mrb[1].mxu0 }
 0x2cb   : > { %v4259_v4 = vadd.f32 %v4258_v36, %v4257_v24  ;;  %v4260_v14 = vpop.f32.mrb[2].mxu0 }
 0x2cc   : > { %v4261_v47 = vpop.f32.mrb[3].mxu0 }
 0x2cd   : > { %v4262_v50 = vadd.f32 %v4261_v47, %v4260_v14 }
 0x2d1   : > { %v4263_v53 = vpop.f32.mrb[4].mxu0 }
 0x2d2   : > { %v4264_v57 = vpop.f32.mrb[5].mxu0 }
 0x2d3   : > { %v4265_v9 = vadd.f32 %v4264_v57, %v4263_v53  ;;  %v4266_v41 = vpop.f32.mrb[6].mxu0 }
 0x2d4   : > { %v4267_v35 = vpop.f32.mrb[7].mxu0 }
 0x2d5   : > { %v4268_v13 = vadd.f32 %v4267_v35, %v4266_v41 }
 0x2d9   : > { %v4269_v29 = vpop.f32.mrb[8].mxu0 }
 0x2da   : > { %v4270_v42 = vpop.f32.mrb[9].mxu0 }
 0x2db   : > { %v4271_v62 = vadd.f32 %v4270_v42, %v4269_v29  ;;  %v4272_v43 = vpop.f32.mrb[10].mxu0 }
 0x2dc   : > { %v4273_v10 = vpop.f32.mrb[11].mxu0 }
 0x2dd   : > { %v4274_v63 = vadd.f32 %v4273_v10, %v4272_v43 }
 0x2e1   : > { %v4275_v2 = vpop.f32.mrb[12].mxu0 }
 0x2e2   : > { %v4276_v15 = vpop.f32.mrb[13].mxu0 }
 0x2e3   : > { %v4277_v28 = vadd.f32 %v4276_v15, %v4275_v2  ;;  %v4278_v3 = vpop.f32.mrb[14].mxu0 }
 0x2e4   : > { %v4279_v5 = vpop.f32.mrb[15].mxu0 }
 0x2e5   : > { %v4280_v32 = vadd.f32 %v4279_v5, %v4278_v3 }
 0x2e9   : > { %v4309_v44 = vpop.f32.mrb[16].mxu0 }
 0x2ea   : > { %v4310_v6 = vpop.f32.mrb[17].mxu0 }
 0x2eb   : > { %v4311_v20 = vadd.f32 %v4310_v6, %v4309_v44  ;;  %v4312_v8 = vpop.f32.mrb[18].mxu0 }
 0x2ec   : > { %v4313_v61 = vpop.f32.mrb[19].mxu0 }
 0x2ed   : > { %v4660_v11 = vadd.f32 %v4311_v20, %v4259_v4  ;;  %v4314_v1 = vadd.f32 %v4313_v61, %v4312_v8 }
 0x2ef   : > { %v4666_v39 = vadd.f32 %v4314_v1, %v4262_v50 }
 0x2f1   : > { %v4315_v7 = vpop.f32.mrb[20].mxu0 }
 0x2f2   : > { %v4316_v23 = vpop.f32.mrb[21].mxu0 }
 0x2f3   : > { %v4317_v16 = vadd.f32 %v4316_v23, %v4315_v7  ;;  %v4318_v17 = vpop.f32.mrb[22].mxu0 }
 0x2f4   : > { %v4319_v22 = vpop.f32.mrb[23].mxu0 }
 0x2f5   : > { %v4657_v26 = vadd.f32 %v4317_v16, %v4265_v9  ;;  %v4320_v38 = vadd.f32 %v4319_v22, %v4318_v17 }
 0x2f7   : > { %v4663_v45 = vadd.f32 %v4320_v38, %v4268_v13 }
 0x2f9   : > { %v4321_v48 = vpop.f32.mrb[24].mxu0 }
 0x2fa   : > { %v4322_v31 = vpop.f32.mrb[25].mxu0 }
 0x2fb   : > { %v4323_v54 = vadd.f32 %v4322_v31, %v4321_v48  ;;  %v4324_v56 = vpop.f32.mrb[26].mxu0 }
 0x2fc   : > { %v4325_v59 = vpop.f32.mrb[27].mxu0 }
 0x2fd   : > { %v4672_v12 = vadd.f32 %v4323_v54, %v4271_v62  ;;  %v4326_v19 = vadd.f32 %v4325_v59, %v4324_v56 }
 0x2ff   : > { %v4678_v55 = vadd.f32 %v4326_v19, %v4274_v63 }
 0x301   : > { %v4327_v40 = vpop.f32.mrb[28].mxu0 }
 0x302   : > { %v4328_v52 = vpop.f32.mrb[29].mxu0 }
 0x303   : > { %v4329_v34 = vadd.f32 %v4328_v52, %v4327_v40  ;;  %v4330_v24 = vpop.f32.mrb[30].mxu0 }
 0x304   : > { %v4331_v36 = vpop.f32.mrb[31].mxu0 }
 0x305   : > { %v4669_v37 = vadd.f32 %v4329_v34, %v4277_v28  ;;  %v4332_v4 = vadd.f32 %v4331_v36, %v4330_v24 }
 0x307   : > { %v4675_v14 = vadd.f32 %v4332_v4, %v4280_v32 }
 0x309   : > { %v4361_v33 = vpop.f32.mrb[32].mxu0 }
 0x30a   : > { %v4362_v46 = vpop.f32.mrb[33].mxu0  ;;  %v4509_v47 = vpop.f32.mrb[32].mxu1 }
 0x30b   : > { %v4363_v50 = vadd.f32 %v4362_v46, %v4361_v33  ;;  %v4364_v21 = vpop.f32.mrb[34].mxu0  ;;  %v3206_v51 = vpop.f32.mrb[33].mxu1 }
 0x30c   : > { %v4365_v0 = vpop.f32.mrb[35].mxu0  ;;  %v4510_v53 = vpop.f32.mrb[34].mxu1 }
 0x30d   : > { %v4366_v57 = vadd.f32 %v4365_v0, %v4364_v21  ;;  %v4661_v58 = vadd.f32 %v4660_v11, %v4363_v50  ;;  %v3209_v9 = vpop.f32.mrb[35].mxu1  ;;  %v3362_v0 = vld [vmem:[%s6127_s13 + $0x70] sm:$0xff] }
 0x30f   : > { %v5997_v41 = vadd.f32 %v4661_v58, %v3206_v51  ;;  %v4667_v35 = vadd.f32 %v4666_v39, %v4366_v57  ;;  %v4965_v58 = vld [vmem:[#allocation8 + $0x18] sm:$0xff]  }
 0x311   : > { %v5999_v13 = vadd.f32 %v4667_v35, %v3209_v9  ;;  %v4367_v29 = vpop.f32.mrb[36].mxu0  ;;  %v4968_v9 = vld [vmem:[#allocation8 + $0x30] sm:$0xff]   ;;  %v4969_v35 = vld [vmem:[#allocation8 + $0x38] sm:$0xff]  }
 0x312   : > { %v4368_v42 = vpop.f32.mrb[37].mxu0  ;;  %v4513_v62 = vpop.f32.mrb[36].mxu1 }
 0x313   : > { %v4369_v43 = vadd.f32 %v4368_v42, %v4367_v29  ;;  %v4370_v10 = vpop.f32.mrb[38].mxu0  ;;  %v3222_v63 = vpop.f32.mrb[37].mxu1  ;;  %v3245_v61 = vadd.f32 %v5999_v13, %v5997_v41  ;;  %v3276_v29 = vld [vmem:[%s6128_s23] sm:$0x1] }
 0x314   : > { %v4371_v2 = vpop.f32.mrb[39].mxu0  ;;  %v4514_v15 = vpop.f32.mrb[38].mxu1 }
 0x315   : > { %v4658_v28 = vadd.f32 %v4657_v26, %v4369_v43  ;;  %v4372_v3 = vadd.f32 %v4371_v2, %v4370_v10  ;;  %v3225_v5 = vpop.f32.mrb[39].mxu1 }
 0x317   : > { %v6001_v32 = vadd.f32 %v4658_v28, %v4509_v47  ;;  %v4664_v44 = vadd.f32 %v4663_v45, %v4372_v3 }
 0x319   : > { %v6003_v6 = vadd.f32 %v4664_v44, %v4510_v53  ;;  %v4373_v20 = vpop.f32.mrb[40].mxu0  ;;  %v3246_v7 = vadd.f32 %v6001_v32, %v3245_v61  ;;  %v3363_v53 = vld [vmem:[%s6127_s13 + $0x78] sm:$0xff] }
 0x31a   : > { %v4374_v8 = vpop.f32.mrb[41].mxu0  ;;  %v4655_v57 = vpack.c.bf16 %v3363_v53, %v3362_v0 }
 0x31b   : > { %v4375_v11 = vadd.f32 %v4374_v8, %v4373_v20  ;;  %v4376_v1 = vpop.f32.mrb[42].mxu0  ;;  %v3247_v26 = vadd.f32 %v6003_v6, %v3246_v7 }
 0x31c   : > { %v4377_v39 = vpop.f32.mrb[43].mxu0  ;;  %4656 = vmatpush3.bf16.msra.mxu1 %v4655_v57 }
 0x31d   : > { %v4673_v23 = vadd.f32 %v4672_v12, %v4375_v11  ;;  %v4378_v16 = vadd.f32 %v4377_v39, %v4376_v1 }
 0x31f   : > { %v6008_v17 = vadd.f32 %v4673_v23, %v3222_v63  ;;  %v4679_v22 = vadd.f32 %v4678_v55, %v4378_v16 }
 0x321   : > { %v6011_v38 = vadd.f32 %v4679_v22, %v3225_v5  ;;  %v4379_v45 = vpop.f32.mrb[44].mxu0  ;;  %v3248_v31 = vadd.f32 %v6008_v17, %v3247_v26 }
 0x322   : > { %v4380_v48 = vpop.f32.mrb[45].mxu0 }
 0x323   : > { %v4381_v54 = vadd.f32 %v4380_v48, %v4379_v45  ;;  %v4382_v56 = vpop.f32.mrb[46].mxu0  ;;  %v3249_v52 = vadd.f32 %v6011_v38, %v3248_v31 }
 0x324   : > { %v4383_v59 = vpop.f32.mrb[47].mxu0 }
 0x325   : > { %v4670_v19 = vadd.f32 %v4669_v37, %v4381_v54  ;;  %v4384_v40 = vadd.f32 %v4383_v59, %v4382_v56  ;;  %v4963_v37 = vld [vmem:[#allocation8 + $0x8] sm:$0xff]  }
 0x327   : > { %v6015_v12 = vadd.f32 %v4670_v19, %v4513_v62  ;;  %v4676_v34 = vadd.f32 %v4675_v14, %v4384_v40  ;;  %v4964_v14 = vld [vmem:[#allocation8 + $0x10] sm:$0xff]  }
 0x329   : > { %v3250_v55 = vadd.f32 %v6015_v12, %v3249_v52  ;;  %v6018_v24 = vadd.f32 %v4676_v34, %v4514_v15 }
 0x32b   : > { %v3251_v36 = vadd.f32 %v6018_v24, %v3250_v55 }
 0x32d   : > { %v3252_v4 = vrot.slane %v3251_v36, 4 }
 0x32f   : > { %v3253_v33 = vadd.f32 %v3252_v4, %v3251_v36 }
 0x331   : > { %v3254_v46 = vrot.slane %v3253_v33, 2 }
 0x333   : > { %v3255_v47 = vadd.f32 %v3254_v46, %v3253_v33 }
 0x335   : > { %v3256_v50 = vrot.slane %v3255_v47, 1 }
 0x337   : > { %v3257_v21 = vadd.f32 %v3256_v50, %v3255_v47 }
 0x339   : > { %v3259_v51 = vmul.f32 0.015625, %v3257_v21 }
 0x33b   : > { %4548 = vmatmul.mubr.f32.vlgmr.msra.gmra.mrb[48].mxu0 %v3259_v51 }
 0x33c   : > { %4586 = vmatpush3.bf16.msra.mxu0 %v5978_v60  ;;  %4601 = vmatprep.mubr.bf16.mxu0 %v5686_v49  ;;  %v4966_v60 = vld [vmem:[#allocation8 + $0x20] sm:$0xff]   ;;  %v4967_v49 = vld [vmem:[#allocation8 + $0x28] sm:$0xff]  }
 0x33d   : > { %4587 = vmatprep.subr.bf16.mxu0 %v4963_v37 }
 0x340   : > { %4588 = vmatpush3.bf16.msra.mxu0 %v4963_v37 }
 0x341   : > { %4589 = vmatprep.subr.bf16.mxu0 %v4964_v14 }
 0x344   : > { %4590 = vmatpush3.bf16.msra.mxu0 %v4964_v14 }
 0x345   : > { %4591 = vmatprep.subr.bf16.mxu0 %v4965_v58 }
 0x348   : > { %4592 = vmatpush3.bf16.msra.mxu0 %v4965_v58 }
 0x349   : > { %4593 = vmatprep.subr.bf16.mxu0 %v4966_v60 }
 0x34c   : > { %4594 = vmatpush3.bf16.msra.mxu0 %v4966_v60 }
 0x34d   : > { %4595 = vmatprep.subr.bf16.mxu0 %v4967_v49 }
 0x350   : > { %4596 = vmatpush3.bf16.msra.mxu0 %v4967_v49 }
 0x351   : > { %4597 = vmatprep.subr.bf16.mxu0 %v4968_v9 }
 0x354   : > { %4598 = vmatpush3.bf16.msra.mxu0 %v4968_v9 }
 0x355   : > { %4599 = vmatprep.subr.bf16.mxu0 %v4969_v35 }
 0x358   : > { %4600 = vmatpush3.bf16.msra.mxu0 %v4969_v35 }
 0x35b   : > { %4602 = vmatmul.mubr.bf16.vlgmr.msra.gmra.mrb[52].mxu0 %v5691_v18 }
 0x35c   : > { %4605 = vmatprep.mubr.bf16.mxu0 %v5696_v30  ;;  %v3364_v30 = vld [vmem:[%s6129_s16] sm:$0x1] }
 0x363   : > { %4606 = vmatmul.mubr.bf16.gmra.mrb[56].mxu0 %v5701_v27 }
 0x40e   : > { %v3343_v42 = vpop.f32.mrb[48].mxu0 }
 0x40f   : > { %v3344_v62 = vadd.f32 %v3343_v42, %v3276_v29  ;;  %v4549_v43 = vpop.f32.mrb[49].mxu0 }
 0x411   : > { %v3347_v10 = vmax.f32 %v3344_v62, 0.0 }
 0x413   : > { %4583 = vmatmul.mubr.f32.vlgmr.msra.gmra.mrb[40].mxu1 %v3347_v10 }
 0x42e   : > { %v4603_v63 = vpop.f32.mrb[52].mxu0 }
 0x42f   : > { %v3535_v2 = vpop.f32.mrb[53].mxu0 }
 0x430   : > { %v4604_v15 = vpop.f32.mrb[54].mxu0 }
 0x431   : > { %v3538_v28 = vpop.f32.mrb[55].mxu0 }
 0x436   : > { %v4607_v3 = vpop.f32.mrb[56].mxu0 }
 0x437   : > { %v3551_v5 = vpop.f32.mrb[57].mxu0 }
 0x438   : > { %v4608_v18 = vpop.f32.mrb[58].mxu0 }
 0x439   : > { %v3554_v44 = vpop.f32.mrb[59].mxu0 }
 0x4e6   : > { %v3431_v27 = vpop.f32.mrb[40].mxu1 }
 0x4e7   : > { %v3432_v20 = vadd.f32 %v3431_v27, %v3364_v30  ;;  %v4584_v8 = vpop.f32.mrb[41].mxu1 }
 0x4e9   : > { %v4084_v61 = vmul.f32 -1.442695, %v3432_v20 }
 0x4eb   : > { %4970 = vpow2.f32 %v4084_v61 }
 0x4f5   : > { %v4971_v11 = vpop.eup %4970 }
 0x4f6   : > { %v3438_v1 = vadd.f32 1.0, %v4971_v11 }
 0x4f8   : > { %4972 = vrcp.f32 %v3438_v1 }
 0x502   : > { %v4973_v39 = vpop.eup %4972 }
 0x503   : > { %v3444_v7 = vrot.slane %v4973_v39, %v5466_v25 }
 0x505   : > { %v3447_v23 = vmul.f32 %v6001_v32, %v3444_v7  ;;  %v3445_v16 = vmul.f32 %v5997_v41, %v3444_v7  ;;  %v3448_v22 = vmul.f32 %v6003_v6, %v3444_v7  ;;  %v3446_v26 = vmul.f32 %v5999_v13, %v3444_v7 }
 0x506   : > { %v3451_v45 = vmul.f32 %v6015_v12, %v3444_v7  ;;  %v3449_v48 = vmul.f32 %v6008_v17, %v3444_v7  ;;  %v3452_v31 = vmul.f32 %v6018_v24, %v3444_v7  ;;  %v3450_v54 = vmul.f32 %v6011_v38, %v3444_v7 }
 0x507   : > { %v3544_v56 = vadd.f32 %v4603_v63, %v3447_v23  ;;  %v3536_v59 = vadd.f32 %v3535_v2, %v3445_v16  ;;  %v3547_v19 = vadd.f32 %v4604_v15, %v3448_v22  ;;  %v3539_v25 = vadd.f32 %v3538_v28, %v3446_v26 }
 0x508   : > { %v3560_v40 = vadd.f32 %v4607_v3, %v3451_v45  ;;  %v3552_v32 = vadd.f32 %v3551_v5, %v3449_v48  ;;  %v3563_v52 = vadd.f32 %v4608_v18, %v3452_v31  ;;  %v3555_v41 = vadd.f32 %v3554_v44, %v3450_v54 }
 0x509   : > { %v3576_v34 = vrot.slane %v3544_v56, 7  ;;  %v3574_v6 = vrot.slane %v3536_v59, 7  ;;  %v3577_v55 = vrot.slane %v3547_v19, 7  ;;  %v3575_v13 = vrot.slane %v3539_v25, 7 }
 0x50a   : > { %v3580_v36 = vrot.slane %v3560_v40, 7  ;;  %v3578_v12 = vrot.slane %v3552_v32, 7  ;;  %v3581_v17 = vrot.slane %v3563_v52, 7  ;;  %v3579_v24 = vrot.slane %v3555_v41, 7 }
 0x50b   : > { %v3592_v38 = vsel %vm806_vm0, 0.0, %v3576_v34  ;;  %v3600_v4 = vsel %vm806_vm0, %v3576_v34, 0.0  ;;  %v3590_v33 = vsel %vm806_vm0, 0.0, %v3574_v6  ;;  %v3598_v46 = vsel %vm806_vm0, %v3574_v6, 0.0 }
 0x50c   : > { %v4149_v47 = vpack.c.bf16 %v3592_v38, %v3592_v38  ;;  %v4150_v50 = vpack.c.bf16 %v3600_v4, %v3600_v4  ;;  %v4145_v21 = vpack.c.bf16 %v3590_v33, %v3590_v33  ;;  %v4146_v51 = vpack.c.bf16 %v3598_v46, %v3598_v46 }
 0x50d   : > { %v3593_v37 = vsel %vm806_vm0, 0.0, %v3577_v55  ;;  %v3601_v14 = vsel %vm806_vm0, %v3577_v55, 0.0  ;;  %v3591_v0 = vsel %vm806_vm0, 0.0, %v3575_v13  ;;  %v3599_v53 = vsel %vm806_vm0, %v3575_v13, 0.0 }
 0x50e   : > { %3676 = vst [vmem:[%s5715_s19 + $0x18] sm:$0xf] %v4149_v47  ;;  %3677 = vst [vmem:[%s5715_s19 + $0x1c] sm:$0x1] %v4150_v50  ;;  %v4151_v57 = vpack.c.bf16 %v3593_v37, %v3593_v37  ;;  %v4152_v58 = vpack.c.bf16 %v3601_v14, %v3601_v14  ;;  %v4147_v60 = vpack.c.bf16 %v3591_v0, %v3591_v0  ;;  %v3596_v9 = vsel %vm806_vm0, 0.0, %v3580_v36 }
 0x50f   : > { %3672 = vst [vmem:[%s5715_s19 + $0x8] sm:$0xf] %v4145_v21  ;;  %3673 = vst [vmem:[%s5715_s19 + $0xc] sm:$0x1] %v4146_v51  ;;  %v4148_v49 = vpack.c.bf16 %v3599_v53, %v3599_v53  ;;  %v3604_v35 = vsel %vm806_vm0, %v3580_v36, 0.0  ;;  %v3594_v29 = vsel %vm806_vm0, 0.0, %v3578_v12  ;;  %v4157_v62 = vpack.c.bf16 %v3596_v9, %v3596_v9 }
 0x510   : > { %v3602_v42 = vsel %vm806_vm0, %v3578_v12, 0.0  ;;  %3678 = vst [vmem:[%s5715_s19 + $0x20] sm:$0xf] %v4151_v57  ;;  %3679 = vst [vmem:[%s5715_s19 + $0x24] sm:$0x1] %v4152_v58  ;;  %v4158_v43 = vpack.c.bf16 %v3604_v35, %v3604_v35  ;;  %v4153_v10 = vpack.c.bf16 %v3594_v29, %v3594_v29  ;;  %v3597_v2 = vsel %vm806_vm0, 0.0, %v3581_v17 }
 0x511   : > { %3674 = vst [vmem:[%s5715_s19 + $0x10] sm:$0xf] %v4147_v60  ;;  %3675 = vst [vmem:[%s5715_s19 + $0x14] sm:$0x1] %v4148_v49  ;;  %v4154_v63 = vpack.c.bf16 %v3602_v42, %v3602_v42  ;;  %v3605_v15 = vsel %vm806_vm0, %v3581_v17, 0.0  ;;  %v3595_v28 = vsel %vm806_vm0, 0.0, %v3579_v24  ;;  %v4159_v5 = vpack.c.bf16 %v3597_v2, %v3597_v2 }
 0x512   : > { %v3603_v3 = vsel %vm806_vm0, %v3579_v24, 0.0  ;;  %3684 = vst [vmem:[%s5715_s19 + $0x38] sm:$0xf] %v4157_v62  ;;  %3685 = vst [vmem:[%s5715_s19 + $0x3c] sm:$0x1] %v4158_v43  ;;  %v4160_v18 = vpack.c.bf16 %v3605_v15, %v3605_v15  ;;  %v4155_v44 = vpack.c.bf16 %v3595_v28, %v3595_v28 }
 0x513   : > { %3680 = vst [vmem:[%s5715_s19 + $0x28] sm:$0xf] %v4153_v10  ;;  %3681 = vst [vmem:[%s5715_s19 + $0x2c] sm:$0x1] %v4154_v63  ;;  %v4156_v30 = vpack.c.bf16 %v3603_v3, %v3603_v3 }
 0x514   : > { %3686 = vst [vmem:[%s5715_s19 + $0x40] sm:$0xf] %v4159_v5  ;;  %3687 = vst [vmem:[%s5715_s19 + $0x44] sm:$0x1] %v4160_v18 }
 0x515   : > { %3682 = vst [vmem:[%s5715_s19 + $0x30] sm:$0xf] %v4155_v44  ;;  %3683 = vst [vmem:[%s5715_s19 + $0x34] sm:$0x1] %v4156_v30 }
 0x516 PF: > { %s6130_s22 = sld [smem:[#allocation18_spill]] }
 0x51c   : > { %s28_s29 = sadd.s32 1, %s6130_s22  }
 0x51d   : > { %p25_p9 = scmp.ge.s32.totalorder %s28_s29, 4  }
 0x51f   :  { %27 = sbr.rel (!%p25_p9) target bundleno = 8 (0x8), region = 137 }
 0x526   :  { %3711 = vsyncpa [#allocation5], 1 }
 0x527   :  { %3713 = vsyncpa [#allocation5 + $0x1], 1 }
 0x528   :  { %3714 = vsyncpa [#allocation7], 1 }
 0x529   :  { %3715 = vsyncpa [#allocation10], 1 }
 0x52a   :  { %3716 = vsyncpa [#allocation13], 1 }

</bundles_post_ra>
